<compile_context>
chip_gen: v7x
topology: tpu7x:2x2x1
jax: 0.10.0
libtpu: 0.0.40
codegen_flags: <defaults>
</compile_context>

<pallas_src>
import functools

import jax
import jax.numpy as jnp
from jax.experimental import pallas as pl
from jax.experimental.pallas import tpu as pltpu


_MIN_PALLAS_NODES = 512          # below this, use the XLA fallback
_LANE = 128


def _round_up(x, m):
    return ((x + m - 1) // m) * m


def pad_nodes(n):
    """Node-dimension padding rule: next multiple of 256 (never 1024)."""
    return _round_up(max(n, 256), 256)


def _largest_divisor_tile(n, cap, unit=_LANE):
    """Largest multiple of `unit` that divides n and is <= cap."""
    c = min(n, max(unit, (cap // unit) * unit))
    while c > unit and n % c != 0:
        c -= unit
    return c


def _vmem_budget_bytes():
    """Generation-aware VMEM budget (leave ~25% headroom for the compiler)."""
    phys = None
    try:
        phys = int(pltpu.get_tpu_info().vmem_capacity_bytes)
    except Exception:
        phys = None
    if not phys or phys <= 0:
        phys = 64 * 1024 * 1024          # conservative: v7x per-core VMEM
    budget = min(96 * 1024 * 1024, (phys * 3) // 4)
    return max(budget, 32 * 1024 * 1024)


def _choose_tiles(n_pad, d_pad):
    """Pick (tm, tk, emb_resident, vmem_limit_bytes) for the layer kernel."""
    budget = _vmem_budget_bytes()

    # Row tile: keep grid[0] >= 2 so the "parallel" axis can split across the
    # two v7x TensorCores / v5e-v6e megacore.
    tm = _largest_divisor_tile(n_pad, min(1024, n_pad // 2))

    # Keep E_l fully VMEM-resident when it is cheap (<= 1/4 of the budget,
    # assuming worst-case double buffering); otherwise stream it per K tile.
    emb_resident = 2 * n_pad * d_pad * 4 <= budget // 4

    # Reduction tile: as large as the VMEM budget allows (multi-MiB bf16
    # adjacency tiles amortize the fixed per-grid-step overhead).
    tk_cap = 4096
    while True:
        tk = _largest_divisor_tile(n_pad, tk_cap)
        adj_bytes = 2 * tm * tk * 2                                  # bf16 A tile, double buffered
        emb_bytes = 2 * (n_pad if emb_resident else tk) * d_pad * 4  # f32 E_l
        row_bytes = 2 * tm * d_pad * 4 * 3 + tm * d_pad * 4          # acc in/out, emb out, scratch
        if adj_bytes + emb_bytes + row_bytes <= budget or tk == _LANE:
            break
        tk_cap = tk - _LANE

    return tm, tk, emb_resident, budget


def _lgconv_layer_kernel(adj_ref, emb_ref, acc_in_ref,
                         emb_out_ref, acc_out_ref, acc_scratch,
                         *, tk, emb_resident):
    """One LGConv layer tile: acc_scratch += A[i,k] @ E[k]; finalize on last k.

    adj_ref:     (TM, TK)           bf16 adjacency tile
    emb_ref:     (N_pad or TK, Dp)  f32 previous-layer embeddings
    acc_in_ref:  (TM, Dp)           f32 running sum of layer embeddings so far
    emb_out_ref: (TM, Dp)           f32 new layer embeddings (next layer input)
    acc_out_ref: (TM, Dp)           f32 updated running sum (aliased in place)
    """
    k = pl.program_id(1)

    @pl.when(k == 0)
    def _():
        acc_scratch[...] = jnp.zeros_like(acc_scratch)

    if emb_resident:
        k0 = pl.multiple_of(k * tk, tk)
        e_tile = emb_ref[pl.ds(k0, tk), :]
    else:
        e_tile = emb_ref[...]

    acc_scratch[...] += jnp.dot(adj_ref[...], e_tile,
                                preferred_element_type=jnp.float32)

    @pl.when(k == pl.num_programs(1) - 1)
    def _():
        new_emb = acc_scratch[...]
        emb_out_ref[...] = new_emb.astype(emb_out_ref.dtype)
        acc_out_ref[...] = acc_in_ref[...] + new_emb


def _lgconv_layer(adj_bf16, emb_f32, acc_f32, *, tm, tk, emb_resident,
                  vmem_limit_bytes):
    """Runs one propagation layer with a tiled (row, K) grid."""
    n_pad, d_pad = emb_f32.shape
    grid = (n_pad // tm, n_pad // tk)

    if emb_resident:
        # Constant block index -> fetched once, stays resident in VMEM.
        emb_spec = pl.BlockSpec((n_pad, d_pad), lambda i, k: (0, 0))
        emb_bytes = n_pad * d_pad * 4
    else:
        emb_spec = pl.BlockSpec((tk, d_pad), lambda i, k: (k, 0))
        emb_bytes = grid[0] * n_pad * d_pad * 4

    flops = 2 * n_pad * n_pad * d_pad
    bytes_accessed = (n_pad * n_pad * 2          # bf16 adjacency stream
                      + emb_bytes                # embeddings
                      + 3 * n_pad * d_pad * 4)   # acc in/out + emb out

    kernel = functools.partial(_lgconv_layer_kernel, tk=tk,
                               emb_resident=emb_resident)

    emb_next, acc_next = pl.pallas_call(
        kernel,
        out_shape=(
            jax.ShapeDtypeStruct((n_pad, d_pad), jnp.float32),
            jax.ShapeDtypeStruct((n_pad, d_pad), jnp.float32),
        ),
        grid_spec=pltpu.PrefetchScalarGridSpec(
            num_scalar_prefetch=0,
            grid=grid,
            in_specs=[
                pl.BlockSpec((tm, tk), lambda i, k: (i, k)),      # adjacency tile
                emb_spec,                                         # prev embeddings
                pl.BlockSpec((tm, d_pad), lambda i, k: (i, 0)),   # running sum in
            ],
            out_specs=[
                pl.BlockSpec((tm, d_pad), lambda i, k: (i, 0)),   # new embeddings
                pl.BlockSpec((tm, d_pad), lambda i, k: (i, 0)),   # running sum out
            ],
            scratch_shapes=[pltpu.VMEM((tm, d_pad), jnp.float32)],
        ),
        compiler_params=pltpu.CompilerParams(
            dimension_semantics=("parallel", "arbitrary"),
            vmem_limit_bytes=vmem_limit_bytes,
        ),
        cost_estimate=pl.CostEstimate(
            flops=flops, bytes_accessed=bytes_accessed, transcendentals=0),
        input_output_aliases={2: 1},   # running sum is updated in place
    )(adj_bf16, emb_f32, acc_f32)
    return emb_next, acc_next


def prepare_adjacency(adj_norm, n_pad=None):
    """Pad + bf16-cast the normalized adjacency ONCE, outside the forward.

    The adjacency is static across forward calls; doing this per call would
    add a full N^2 read + write of HBM that the kernels never use.
    """
    n = adj_norm.shape[0]
    if n_pad is None:
        n_pad = pad_nodes(n)
    adj_p = jnp.zeros((n_pad, n_pad), jnp.bfloat16)
    adj_p = adj_p.at[:n, :n].set(adj_norm.astype(jnp.bfloat16))
    return adj_p


@functools.partial(jax.jit, static_argnames=("num_users", "num_layers"))
def lightgcn_forward_pallas(adj_padded_bf16, emb0, num_users, num_layers):
    """adj_padded_bf16: (N_pad, N_pad) from prepare_adjacency; emb0: (N, D) f32."""
    n_pad = adj_padded_bf16.shape[0]
    n, d = emb0.shape
    d_pad = _round_up(max(d, _LANE), _LANE)   # lane-dense; do NOT pad D to 256

    emb_p = jnp.zeros((n_pad, d_pad), jnp.float32).at[:n, :d].set(emb0)

    if n_pad < _MIN_PALLAS_NODES:
        # Small-graph fallback: XLA dense matmul already hits the roofline and
        # avoids per-call launch / pipelining overhead on tiny problems.
        adj_f32 = adj_padded_bf16.astype(jnp.float32)
        emb = emb_p
        acc = jnp.zeros_like(emb_p)
        for _ in range(num_layers):
            emb = adj_f32 @ emb
            acc = acc + emb
    else:
        tm, tk, emb_resident, vmem_limit_bytes = _choose_tiles(n_pad, d_pad)
        emb = emb_p
        # Start the running sum at zero (distinct buffer from emb_p so the
        # in-place alias never shares a buffer with the emb operand) and add
        # the layer-0 embeddings back at the end.
        acc = jnp.zeros_like(emb_p)
        for _ in range(num_layers):
            emb, acc = _lgconv_layer(adj_padded_bf16, emb, acc,
                                     tm=tm, tk=tk, emb_resident=emb_resident,
                                     vmem_limit_bytes=vmem_limit_bytes)

    acc = acc + emb_p   # sum_{l=0..L} e_l

    # emb_final = 1/(L+1) * mean(stack(embs), dim=1) = sum_l e_l / (L+1)^2
    # (matches the reference module literally).
    scale = 1.0 / float((num_layers + 1) * (num_layers + 1))
    emb_final = (acc * scale)[:n, :d]
    return emb_final[:num_users], emb_final[num_users:]


def build_normalized_adjacency(edge_index, num_nodes):
    """Dense gcn_norm (add_self_loops=False): A[dst, src] = 1/sqrt(deg(src)deg(dst)).

    Degrees are taken from the dst column; this equals the node degree for the
    symmetric (both-direction) interaction edge sets LightGCN uses.
    """
    # TODO(synk): for real (sparse) graphs, skip the dense A entirely and use a
    # block-sparse SpMM with PrefetchScalarGridSpec-driven tile skipping.
    src = edge_index[0]
    dst = edge_index[1]
    deg = jnp.zeros((num_nodes,), jnp.float32).at[dst].add(1.0)
    deg_inv_sqrt = jnp.where(deg > 0, jax.lax.rsqrt(jnp.maximum(deg, 1e-12)), 0.0)
    w = deg_inv_sqrt[src] * deg_inv_sqrt[dst]
    adj = jnp.zeros((num_nodes, num_nodes), jnp.float32).at[dst, src].add(w)
    return adj


def make_example_graph(num_users, num_items):
    """Deterministic small bipartite interaction graph, both edge directions."""
    srcs, dsts = [], []
    for u in range(num_users):
        for k in range(2):  # each user interacts with 2 items
            it = (u + k) % num_items
            item_node = num_users + it
            srcs.append(u)
            dsts.append(item_node)
            srcs.append(item_node)
            dsts.append(u)
    edge_index = jnp.array([srcs, dsts], dtype=jnp.int32)
    return edge_index


if __name__ == "__main__":
    # Small shapes, but large enough (N = 512) that the Pallas path runs.
    num_users = 256
    num_items = 256
    num_layers = 4
    dim_h = 64
    num_nodes = num_users + num_items

    key = jax.random.PRNGKey(0)
    k_user, k_item = jax.random.split(key)
    # nn.init.normal_(std=0.01) on both embedding tables, then torch.cat([...]).
    user_emb = 0.01 * jax.random.normal(k_user, (num_users, dim_h), jnp.float32)
    item_emb = 0.01 * jax.random.normal(k_item, (num_items, dim_h), jnp.float32)
    emb0 = jnp.concatenate([user_emb, item_emb], axis=0)

    edge_index = make_example_graph(num_users, num_items)
    adj_norm = build_normalized_adjacency(edge_index, num_nodes)

    # Pad + cast the static adjacency exactly once, outside the jitted forward.
    adj_p = prepare_adjacency(adj_norm)

    emb_users_final, emb_items_final = lightgcn_forward_pallas(
        adj_p, emb0, num_users, num_layers)
    jax.block_until_ready((emb_users_final, emb_items_final))

    # Pure-JAX f32 reference of the same semantics (kernel uses a bf16
    # adjacency operand, hence the slightly loosened tolerance).
    cur = emb0
    acc = emb0
    for _ in range(num_layers):
        cur = adj_norm @ cur
        acc = acc + cur
    ref = acc / float((num_layers + 1) ** 2)

    err_u = float(jnp.max(jnp.abs(emb_users_final - ref[:num_users])))
    err_i = float(jnp.max(jnp.abs(emb_items_final - ref[num_users:])))
    assert jnp.allclose(emb_users_final, ref[:num_users], atol=5e-4), err_u
    assert jnp.allclose(emb_items_final, ref[num_users:], atol=5e-4), err_i

    print("KERNEL_OK")
</pallas_src>

<mosaic_0001>
module attributes {stable_mosaic.version = 11 : i64} {
  func.func @_lgconv_layer_kernel(%arg0: i32, %arg1: i32, %arg2: memref<256x512xbf16, #tpu.memory_space<vmem>>, %arg3: memref<512x128xf32, #tpu.memory_space<vmem>>, %arg4: memref<256x128xf32, #tpu.memory_space<vmem>>, %arg5: memref<256x128xf32, #tpu.memory_space<vmem>>, %arg6: memref<256x128xf32, #tpu.memory_space<vmem>>, %arg7: memref<256x128xf32, #tpu.memory_space<vmem>>) attributes {dimension_semantics = [#tpu.dimension_semantics<parallel>, #tpu.dimension_semantics<arbitrary>], iteration_bounds = array<i64: 2, 1>, scalar_prefetch = 0 : i64, scratch_operands = 1 : i64, tpu.core_type = #tpu.core_type<tc>, window_params = [{transform_indices = @transform_0, window_bounds = array<i64: 256, 512>}, {pipeline_mode = #tpu.pipeline_mode<synchronous>, transform_indices = @transform_1, window_bounds = array<i64: 512, 128>}, {transform_indices = @transform_2, window_bounds = array<i64: 256, 128>}, {transform_indices = @transform_3, window_bounds = array<i64: 256, 128>}, {transform_indices = @transform_4, window_bounds = array<i64: 256, 128>}]} {
    %c0_i32 = arith.constant 0 : i32
    %0 = arith.cmpi eq, %arg1, %c0_i32 : i32
    %1 = arith.extui %0 : i1 to i32
    %c0_i32_0 = arith.constant 0 : i32
    %2 = arith.cmpi ne, %1, %c0_i32_0 : i32
    scf.if %2 {
      %cst_9 = arith.constant 0.000000e+00 : f32
      %15 = vector.broadcast %cst_9 : f32 to vector<256x128xf32>
      %c0_10 = arith.constant 0 : index
      %c0_11 = arith.constant 0 : index
      %16 = vector.load %arg7[%c0_10, %c0_11] : memref<256x128xf32, #tpu.memory_space<vmem>>, vector<256x128xf32>
      tpu.vector_store %arg7[%c0_10, %c0_11], %15 {strides = array<i32>} : memref<256x128xf32, #tpu.memory_space<vmem>>, vector<256x128xf32>,
    } else {
    }
    %c512_i32 = arith.constant 512 : i32
    %3 = arith.muli %arg1, %c512_i32 : i32
    %4 = tpu.assume_multiple %3, 512 : i32
    %5 = arith.index_cast %4 : i32 to index
    %c0 = arith.constant 0 : index
    %6 = vector.load %arg3[%5, %c0] : memref<512x128xf32, #tpu.memory_space<vmem>>, vector<512x128xf32>
    %c0_1 = arith.constant 0 : index
    %c0_2 = arith.constant 0 : index
    %7 = vector.load %arg7[%c0_1, %c0_2] : memref<256x128xf32, #tpu.memory_space<vmem>>, vector<256x128xf32>
    %c0_3 = arith.constant 0 : index
    %c0_4 = arith.constant 0 : index
    %8 = vector.load %arg2[%c0_3, %c0_4] : memref<256x512xbf16, #tpu.memory_space<vmem>>, vector<256x512xbf16>
    %cst = arith.constant dense<0.000000e+00> : vector<256x128xf32>
    %9 = tpu.matmul %8, %6, %cst {dimension_numbers = #tpu.dot_dimension_numbers<[1], [0], [0], [1], [0, 0, 1, 1], [], []>} : vector<256x512xbf16>, vector<512x128xf32>, vector<256x128xf32> -> vector<256x128xf32>
    %10 = arith.addf %7, %9 : vector<256x128xf32>
    %c0_5 = arith.constant 0 : index
    %c0_6 = arith.constant 0 : index
    %11 = vector.load %arg7[%c0_5, %c0_6] : memref<256x128xf32, #tpu.memory_space<vmem>>, vector<256x128xf32>
    tpu.vector_store %arg7[%c0_5, %c0_6], %10 {strides = array<i32>} : memref<256x128xf32, #tpu.memory_space<vmem>>, vector<256x128xf32>,
    %c0_i32_7 = arith.constant 0 : i32
    %12 = arith.cmpi eq, %arg1, %c0_i32_7 : i32
    %13 = arith.extui %12 : i1 to i32
    %c0_i32_8 = arith.constant 0 : i32
    %14 = arith.cmpi ne, %13, %c0_i32_8 : i32
    scf.if %14 {
      %c0_9 = arith.constant 0 : index
      %c0_10 = arith.constant 0 : index
      %15 = vector.load %arg7[%c0_9, %c0_10] : memref<256x128xf32, #tpu.memory_space<vmem>>, vector<256x128xf32>
      %c0_11 = arith.constant 0 : index
      %c0_12 = arith.constant 0 : index
      %16 = vector.load %arg5[%c0_11, %c0_12] : memref<256x128xf32, #tpu.memory_space<vmem>>, vector<256x128xf32>
      tpu.vector_store %arg5[%c0_11, %c0_12], %15 {strides = array<i32>} : memref<256x128xf32, #tpu.memory_space<vmem>>, vector<256x128xf32>,
      %c0_13 = arith.constant 0 : index
      %c0_14 = arith.constant 0 : index
      %17 = vector.load %arg4[%c0_13, %c0_14] : memref<256x128xf32, #tpu.memory_space<vmem>>, vector<256x128xf32>
      %18 = arith.addf %17, %15 : vector<256x128xf32>
      %c0_15 = arith.constant 0 : index
      %c0_16 = arith.constant 0 : index
      %19 = vector.load %arg6[%c0_15, %c0_16] : memref<256x128xf32, #tpu.memory_space<vmem>>, vector<256x128xf32>
      tpu.vector_store %arg6[%c0_15, %c0_16], %18 {strides = array<i32>} : memref<256x128xf32, #tpu.memory_space<vmem>>, vector<256x128xf32>,
    } else {
    }
    return
  }
  func.func @transform_0(%arg0: i32, %arg1: i32) -> (i32, i32) {
    %c0_i32 = arith.constant 0 : i32
    return %arg0, %arg1 : i32, i32
  }
  func.func @transform_1(%arg0: i32, %arg1: i32) -> (i32, i32) {
    %c0_i32 = arith.constant 0 : i32
    %c0_i32_0 = arith.constant 0 : i32
    %c0_i32_1 = arith.constant 0 : i32
    return %c0_i32, %c0_i32_0 : i32, i32
  }
  func.func @transform_2(%arg0: i32, %arg1: i32) -> (i32, i32) {
    %c0_i32 = arith.constant 0 : i32
    %c0_i32_0 = arith.constant 0 : i32
    return %arg0, %c0_i32 : i32, i32
  }
  func.func @transform_3(%arg0: i32, %arg1: i32) -> (i32, i32) {
    %c0_i32 = arith.constant 0 : i32
    %c0_i32_0 = arith.constant 0 : i32
    return %arg0, %c0_i32 : i32, i32
  }
  func.func @transform_4(%arg0: i32, %arg1: i32) -> (i32, i32) {
    %c0_i32 = arith.constant 0 : i32
    %c0_i32_0 = arith.constant 0 : i32
    return %arg0, %c0_i32 : i32, i32
  }
}

module attributes {stable_mosaic.version = 11 : i64} {
  func.func @_lgconv_layer_kernel(%arg0: i32, %arg1: i32, %arg2: memref<256x512xbf16, #tpu.memory_space<vmem>>, %arg3: memref<512x128xf32, #tpu.memory_space<vmem>>, %arg4: memref<256x128xf32, #tpu.memory_space<vmem>>, %arg5: memref<256x128xf32, #tpu.memory_space<vmem>>, %arg6: memref<256x128xf32, #tpu.memory_space<vmem>>, %arg7: memref<256x128xf32, #tpu.memory_space<vmem>>) attributes {dimension_semantics = [#tpu.dimension_semantics<parallel>, #tpu.dimension_semantics<arbitrary>], iteration_bounds = array<i64: 2, 1>, scalar_prefetch = 0 : i64, scratch_operands = 1 : i64, tpu.core_type = #tpu.core_type<tc>, window_params = [{transform_indices = @transform_0, window_bounds = array<i64: 256, 512>}, {pipeline_mode = #tpu.pipeline_mode<synchronous>, transform_indices = @transform_1, window_bounds = array<i64: 512, 128>}, {transform_indices = @transform_2, window_bounds = array<i64: 256, 128>}, {transform_indices = @transform_3, window_bounds = array<i64: 256, 128>}, {transform_indices = @transform_4, window_bounds = array<i64: 256, 128>}]} {
    %c0_i32 = arith.constant 0 : i32
    %0 = arith.cmpi eq, %arg1, %c0_i32 : i32
    %1 = arith.extui %0 : i1 to i32
    %c0_i32_0 = arith.constant 0 : i32
    %2 = arith.cmpi ne, %1, %c0_i32_0 : i32
    scf.if %2 {
      %cst_9 = arith.constant 0.000000e+00 : f32
      %15 = vector.broadcast %cst_9 : f32 to vector<256x128xf32>
      %c0_10 = arith.constant 0 : index
      %c0_11 = arith.constant 0 : index
      %16 = vector.load %arg7[%c0_10, %c0_11] : memref<256x128xf32, #tpu.memory_space<vmem>>, vector<256x128xf32>
      tpu.vector_store %arg7[%c0_10, %c0_11], %15 {strides = array<i32>} : memref<256x128xf32, #tpu.memory_space<vmem>>, vector<256x128xf32>,
    } else {
    }
    %c512_i32 = arith.constant 512 : i32
    %3 = arith.muli %arg1, %c512_i32 : i32
    %4 = tpu.assume_multiple %3, 512 : i32
    %5 = arith.index_cast %4 : i32 to index
    %c0 = arith.constant 0 : index
    %6 = vector.load %arg3[%5, %c0] : memref<512x128xf32, #tpu.memory_space<vmem>>, vector<512x128xf32>
    %c0_1 = arith.constant 0 : index
    %c0_2 = arith.constant 0 : index
    %7 = vector.load %arg7[%c0_1, %c0_2] : memref<256x128xf32, #tpu.memory_space<vmem>>, vector<256x128xf32>
    %c0_3 = arith.constant 0 : index
    %c0_4 = arith.constant 0 : index
    %8 = vector.load %arg2[%c0_3, %c0_4] : memref<256x512xbf16, #tpu.memory_space<vmem>>, vector<256x512xbf16>
    %cst = arith.constant dense<0.000000e+00> : vector<256x128xf32>
    %9 = tpu.matmul %8, %6, %cst {dimension_numbers = #tpu.dot_dimension_numbers<[1], [0], [0], [1], [0, 0, 1, 1], [], []>} : vector<256x512xbf16>, vector<512x128xf32>, vector<256x128xf32> -> vector<256x128xf32>
    %10 = arith.addf %7, %9 : vector<256x128xf32>
    %c0_5 = arith.constant 0 : index
    %c0_6 = arith.constant 0 : index
    %11 = vector.load %arg7[%c0_5, %c0_6] : memref<256x128xf32, #tpu.memory_space<vmem>>, vector<256x128xf32>
    tpu.vector_store %arg7[%c0_5, %c0_6], %10 {strides = array<i32>} : memref<256x128xf32, #tpu.memory_space<vmem>>, vector<256x128xf32>,
    %c0_i32_7 = arith.constant 0 : i32
    %12 = arith.cmpi eq, %arg1, %c0_i32_7 : i32
    %13 = arith.extui %12 : i1 to i32
    %c0_i32_8 = arith.constant 0 : i32
    %14 = arith.cmpi ne, %13, %c0_i32_8 : i32
    scf.if %14 {
      %c0_9 = arith.constant 0 : index
      %c0_10 = arith.constant 0 : index
      %15 = vector.load %arg7[%c0_9, %c0_10] : memref<256x128xf32, #tpu.memory_space<vmem>>, vector<256x128xf32>
      %c0_11 = arith.constant 0 : index
      %c0_12 = arith.constant 0 : index
      %16 = vector.load %arg5[%c0_11, %c0_12] : memref<256x128xf32, #tpu.memory_space<vmem>>, vector<256x128xf32>
      tpu.vector_store %arg5[%c0_11, %c0_12], %15 {strides = array<i32>} : memref<256x128xf32, #tpu.memory_space<vmem>>, vector<256x128xf32>,
      %c0_13 = arith.constant 0 : index
      %c0_14 = arith.constant 0 : index
      %17 = vector.load %arg4[%c0_13, %c0_14] : memref<256x128xf32, #tpu.memory_space<vmem>>, vector<256x128xf32>
      %18 = arith.addf %17, %15 : vector<256x128xf32>
      %c0_15 = arith.constant 0 : index
      %c0_16 = arith.constant 0 : index
      %19 = vector.load %arg6[%c0_15, %c0_16] : memref<256x128xf32, #tpu.memory_space<vmem>>, vector<256x128xf32>
      tpu.vector_store %arg6[%c0_15, %c0_16], %18 {strides = array<i32>} : memref<256x128xf32, #tpu.memory_space<vmem>>, vector<256x128xf32>,
    } else {
    }
    return
  }
  func.func @transform_0(%arg0: i32, %arg1: i32) -> (i32, i32) {
    %c0_i32 = arith.constant 0 : i32
    return %arg0, %arg1 : i32, i32
  }
  func.func @transform_1(%arg0: i32, %arg1: i32) -> (i32, i32) {
    %c0_i32 = arith.constant 0 : i32
    %c0_i32_0 = arith.constant 0 : i32
    %c0_i32_1 = arith.constant 0 : i32
    return %c0_i32, %c0_i32_0 : i32, i32
  }
  func.func @transform_2(%arg0: i32, %arg1: i32) -> (i32, i32) {
    %c0_i32 = arith.constant 0 : i32
    %c0_i32_0 = arith.constant 0 : i32
    return %arg0, %c0_i32 : i32, i32
  }
  func.func @transform_3(%arg0: i32, %arg1: i32) -> (i32, i32) {
    %c0_i32 = arith.constant 0 : i32
    %c0_i32_0 = arith.constant 0 : i32
    return %arg0, %c0_i32 : i32, i32
  }
  func.func @transform_4(%arg0: i32, %arg1: i32) -> (i32, i32) {
    %c0_i32 = arith.constant 0 : i32
    %c0_i32_0 = arith.constant 0 : i32
    return %arg0, %c0_i32 : i32, i32
  }
}

</mosaic_0001>

<bundles_post_ra>
// kernel: lightgcn_forward_pallas.4
= control target key start
LH: loop header
LB: loop body
LE: loop exit
PB: predicated region body
PF: predicated region fallthrough
CT: control target
= control target key end

     0   :  { %s2088_s15 = smov 0   ;;  %s2090_s16 = smov 0   ;;  %s2593_s0 = inlined_call_operand.vmem [shape: bf16[512,512], index: 0, kind: input, shape index: {}]   ;;  %s2594_s1 = inlined_call_operand.vmem [shape: f32[512,128], index: 1, kind: input, shape index: {}]   ;;  %s2595_s2 = inlined_call_operand.vmem [shape: f32[512,128], index: 2, kind: input, shape index: {}, may-alias: {2,4}]   ;;  %s2596_s3 = inlined_call_operand.vmem [shape: f32[512,128], index: 3, kind: output, shape index: {0}]   ;;  %s2597_s4 = inlined_call_operand.vmem [shape: f32[512,128], index: 4, kind: output, shape index: {1}, may-alias: {2,4}]  }
   0x1   :  { %s2092_s17 = smov 0  }
   0x2 LB: > { %s27_s18 = sadd.s32 1, %s2057_s16  ;;  %p1522_p0 = scmp.ge.s32.totalorder %s2061_s17, 1  ;;  %s2061_s17 = sphi %s2092_s17, %s15_s17   ;;  %s2057_s16 = sphi %s2090_s16, %s2600_s16   ;;  %s2053_s15 = sphi %s2088_s15, %s2599_s15  }
   0x3   : > { %p29_p1 = scmp.ge.s32.totalorder %s27_s18, 2  ;;  %p197_p2 = scmp.lt.s32.totalorder %s2061_s17, 3 }
   0x5   : > { %s2602_s18 = smov (%p29_p1, %s27_s18), 0  ;;  %p198_p3 = pnand %p1522_p0, %p197_p2 }
   0x6   : > { %v322_v0 = vld [vmem:[%s2594_s1 + $0x80] sm:$0xff] (!%p198_p3)  ;;  %v323_v1 = vld [vmem:[%s2594_s1 + $0x88] sm:$0xff] (!%p198_p3)  ;;  %v324_v11 = vld [vmem:[%s2594_s1 + $0x90] sm:$0xff] (!%p198_p3)  ;;  %s1523_s7 = sshll.u32 (!%p198_p3), %s2053_s15, 5 }
   0x7   : > { %201 = sbr.rel (%p198_p3) target bundleno = 385 (0x181), region = 32  ;;  %v354_v2 = vld [vmem:[%s2594_s1 + $0x180] sm:$0xff] (!%p198_p3)  ;;  %v1855_v3 = vpack.c.bf16 (!%p198_p3), %v323_v1, %v322_v0  ;;  %v355_v4 = vld [vmem:[%s2594_s1 + $0x188] sm:$0xff] (!%p198_p3)  ;;  %v325_v13 = vld [vmem:[%s2594_s1 + $0x98] sm:$0xff] (!%p198_p3)  ;;  %p2192_p4 = scmp.lt.s32.totalorder (!%p198_p3), %s1523_s7, 63 }
   0x8   : > { %v306_v5 = vld [vmem:[%s2594_s1] sm:$0xff] (!%p198_p3)  ;;  %v307_v6 = vld [vmem:[%s2594_s1 + $0x8] sm:$0xff] (!%p198_p3)  ;;  %v1887_v7 = vpack.c.bf16 (!%p198_p3), %v355_v4, %v354_v2  ;;  %v356_v14 = vld [vmem:[%s2594_s1 + $0x190] sm:$0xff] (!%p198_p3)  ;;  %v1859_v16 = vpack.c.bf16 (!%p198_p3), %v325_v13, %v324_v11 }
   0x9   : > { %v1857_v8 = vpack.c.bf16 (!%p198_p3), %v307_v6, %v306_v5  ;;  %v338_v9 = vld [vmem:[%s2594_s1 + $0x100] sm:$0xff] (!%p198_p3)  ;;  %v339_v10 = vld [vmem:[%s2594_s1 + $0x108] sm:$0xff] (!%p198_p3)  ;;  %1856 = vmatprep.subr.bf16.mxu0 (!%p198_p3), %v1855_v3  ;;  %v357_v15 = vld [vmem:[%s2594_s1 + $0x198] sm:$0xff] (!%p198_p3) }
   0xa   : > { %v1889_v12 = vpack.c.bf16 (!%p198_p3), %v339_v10, %v338_v9  ;;  %1888 = vmatprep.subr.bf16.mxu1 (!%p198_p3), %v1887_v7  ;;  %v1891_v17 = vpack.c.bf16 (!%p198_p3), %v357_v15, %v356_v14  ;;  %v308_v18 = vld [vmem:[%s2594_s1 + $0x10] sm:$0xff] (!%p198_p3)  ;;  %v309_v19 = vld [vmem:[%s2594_s1 + $0x18] sm:$0xff] (!%p198_p3)  ;;  %v326_v23 = vld [vmem:[%s2594_s1 + $0xa0] sm:$0xff] (!%p198_p3) }
   0xb   : > { %1858 = vmatpush3.bf16.msra.mxu0 (!%p198_p3), %v1857_v8  ;;  %v340_v20 = vld [vmem:[%s2594_s1 + $0x110] sm:$0xff] (!%p198_p3)  ;;  %v1861_v21 = vpack.c.bf16 (!%p198_p3), %v309_v19, %v308_v18  ;;  %v341_v22 = vld [vmem:[%s2594_s1 + $0x118] sm:$0xff] (!%p198_p3)  ;;  %v327_v24 = vld [vmem:[%s2594_s1 + $0xa8] sm:$0xff] (!%p198_p3) }
   0xc   : > { %1890 = vmatpush3.bf16.msra.mxu1 (!%p198_p3), %v1889_v12  ;;  %1860 = vmatprep.subr.bf16.mxu0 (!%p198_p3), %v1859_v16  ;;  %v1893_v25 = vpack.c.bf16 (!%p198_p3), %v341_v22, %v340_v20  ;;  %v1863_v26 = vpack.c.bf16 (!%p198_p3), %v327_v24, %v326_v23  ;;  %v358_v27 = vld [vmem:[%s2594_s1 + $0x1a0] sm:$0xff] (!%p198_p3)  ;;  %v359_v28 = vld [vmem:[%s2594_s1 + $0x1a8] sm:$0xff] (!%p198_p3)  ;;  %v328_v35 = vld [vmem:[%s2594_s1 + $0xb0] sm:$0xff] (!%p198_p3) }
   0xd   : > { %1892 = vmatprep.subr.bf16.mxu1 (!%p198_p3), %v1891_v17  ;;  %v310_v29 = vld [vmem:[%s2594_s1 + $0x20] sm:$0xff] (!%p198_p3)  ;;  %v1895_v30 = vpack.c.bf16 (!%p198_p3), %v359_v28, %v358_v27  ;;  %v311_v31 = vld [vmem:[%s2594_s1 + $0x28] sm:$0xff] (!%p198_p3)  ;;  %v329_v36 = vld [vmem:[%s2594_s1 + $0xb8] sm:$0xff] (!%p198_p3) }
   0xe   : > { %v342_v32 = vld [vmem:[%s2594_s1 + $0x120] sm:$0xff]  ;;  %v343_v33 = vld [vmem:[%s2594_s1 + $0x128] sm:$0xff]  ;;  %v1865_v34 = vpack.c.bf16 %v311_v31, %v310_v29  ;;  %v360_v37 = vld [vmem:[%s2594_s1 + $0x1b0] sm:$0xff]  ;;  %v1867_v39 = vpack.c.bf16 %v329_v36, %v328_v35  ;;  %s2604_s7 = smov (!%p2192_p4, %s1523_s7), 63 }
   0xf   : > { %1862 = vmatpush3.bf16.msra.mxu0 %v1861_v21  ;;  %v1897_v38 = vpack.c.bf16 %v343_v33, %v342_v32  ;;  %v361_v40 = vld [vmem:[%s2594_s1 + $0x1b8] sm:$0xff]  ;;  %v312_v41 = vld [vmem:[%s2594_s1 + $0x30] sm:$0xff]  ;;  %v330_v46 = vld [vmem:[%s2594_s1 + $0xc0] sm:$0xff]  ;;  %s1598_s24 = sshll.u32 %s2604_s7, 4  ;;  %s2384_s22 = sshll.u32 %s2604_s7, 3 }
  0x10   : > { %1894 = vmatpush3.bf16.msra.mxu1 %v1893_v25  ;;  %1864 = vmatprep.subr.bf16.mxu0 %v1863_v26  ;;  %v313_v42 = vld [vmem:[%s2594_s1 + $0x38] sm:$0xff]  ;;  %v1899_v43 = vpack.c.bf16 %v361_v40, %v360_v37  ;;  %v344_v44 = vld [vmem:[%s2594_s1 + $0x130] sm:$0xff]  ;;  %v331_v47 = vld [vmem:[%s2594_s1 + $0xc8] sm:$0xff]  ;;  %s2287_s23 = scalar_lea.vmem %s2593_s0, %s1598_s24  ;;  %s2390_s27 = scalar_lea.vmem %s2595_s2, %s2384_s22 }
  0x11   : > { %1896 = vmatprep.subr.bf16.mxu1 %v1895_v30  ;;  %v345_v45 = vld [vmem:[%s2594_s1 + $0x138] sm:$0xff]  ;;  %v362_v48 = vld [vmem:[%s2594_s1 + $0x1c0] sm:$0xff]  ;;  %v363_v49 = vld [vmem:[%s2594_s1 + $0x1c8] sm:$0xff]  ;;  %v1869_v50 = vpack.c.bf16 %v313_v42, %v312_v41  ;;  %v1871_v52 = vpack.c.bf16 %v331_v47, %v330_v46  ;;  %s2397_s28 = scalar_lea.vmem %s2596_s3, %s2384_s22  ;;  %s2481_s24 = scalar_lea.vmem %s2597_s4, %s2384_s22 }
  0x12   : > { %v1901_v51 = vpack.c.bf16 %v345_v45, %v344_v44  ;;  %v314_v53 = vld [vmem:[%s2594_s1 + $0x40] sm:$0xff]  ;;  %v315_v54 = vld [vmem:[%s2594_s1 + $0x48] sm:$0xff]  ;;  %v1903_v56 = vpack.c.bf16 %v363_v49, %v362_v48  ;;  %v332_v58 = vld [vmem:[%s2594_s1 + $0xd0] sm:$0xff] }
  0x13   : > { %1866 = vmatpush3.bf16.msra.mxu0 %v1865_v34  ;;  %v346_v55 = vld [vmem:[%s2594_s1 + $0x140] sm:$0xff]  ;;  %v347_v57 = vld [vmem:[%s2594_s1 + $0x148] sm:$0xff]  ;;  %v333_v59 = vld [vmem:[%s2594_s1 + $0xd8] sm:$0xff]  ;;  %v1873_v62 = vpack.c.bf16 %v315_v54, %v314_v53 }
  0x14   : > { %1898 = vmatpush3.bf16.msra.mxu1 %v1897_v38  ;;  %1868 = vmatprep.subr.bf16.mxu0 %v1867_v39  ;;  %v364_v60 = vld [vmem:[%s2594_s1 + $0x1d0] sm:$0xff]  ;;  %v365_v61 = vld [vmem:[%s2594_s1 + $0x1d8] sm:$0xff]  ;;  %v1905_v0 = vpack.c.bf16 %v347_v57, %v346_v55  ;;  %v1875_v1 = vpack.c.bf16 %v333_v59, %v332_v58  ;;  %v334_v6 = vld [vmem:[%s2594_s1 + $0xe0] sm:$0xff] }
  0x15   : > { %1900 = vmatprep.subr.bf16.mxu1 %v1899_v43  ;;  %v316_v63 = vld [vmem:[%s2594_s1 + $0x50] sm:$0xff]  ;;  %v317_v2 = vld [vmem:[%s2594_s1 + $0x58] sm:$0xff]  ;;  %v1907_v5 = vpack.c.bf16 %v365_v61, %v364_v60  ;;  %v335_v7 = vld [vmem:[%s2594_s1 + $0xe8] sm:$0xff] }
  0x16   : > { %v348_v3 = vld [vmem:[%s2594_s1 + $0x150] sm:$0xff]  ;;  %v349_v4 = vld [vmem:[%s2594_s1 + $0x158] sm:$0xff]  ;;  %v366_v8 = vld [vmem:[%s2594_s1 + $0x1e0] sm:$0xff]  ;;  %v1877_v12 = vpack.c.bf16 %v317_v2, %v316_v63  ;;  %v1879_v17 = vpack.c.bf16 %v335_v7, %v334_v6 }
  0x17   : > { %1870 = vmatpush3.bf16.msra.mxu0 %v1869_v50  ;;  %v367_v9 = vld [vmem:[%s2594_s1 + $0x1e8] sm:$0xff]  ;;  %v318_v10 = vld [vmem:[%s2594_s1 + $0x60] sm:$0xff]  ;;  %v336_v15 = vld [vmem:[%s2594_s1 + $0xf0] sm:$0xff]  ;;  %v1909_v16 = vpack.c.bf16 %v349_v4, %v348_v3 }
  0x18   : > { %1902 = vmatpush3.bf16.msra.mxu1 %v1901_v51  ;;  %1872 = vmatprep.subr.bf16.mxu0 %v1871_v52  ;;  %v319_v11 = vld [vmem:[%s2594_s1 + $0x68] sm:$0xff]  ;;  %v350_v13 = vld [vmem:[%s2594_s1 + $0x160] sm:$0xff]  ;;  %v337_v18 = vld [vmem:[%s2594_s1 + $0xf8] sm:$0xff]  ;;  %v1911_v19 = vpack.c.bf16 %v367_v9, %v366_v8 }
  0x19   : > { %1904 = vmatprep.subr.bf16.mxu1 %v1903_v56  ;;  %v351_v14 = vld [vmem:[%s2594_s1 + $0x168] sm:$0xff]  ;;  %v368_v20 = vld [vmem:[%s2594_s1 + $0x1f0] sm:$0xff]  ;;  %v369_v22 = vld [vmem:[%s2594_s1 + $0x1f8] sm:$0xff]  ;;  %v1881_v24 = vpack.c.bf16 %v319_v11, %v318_v10  ;;  %v1883_v27 = vpack.c.bf16 %v337_v18, %v336_v15 }
  0x1a   : > { %v1945_v21 = vld [vmem:[%s2287_s23 + $0x4] ss:$16 sps:$4 sm:$0xff]   ;;  %v1948_v23 = vld [vmem:[%s2287_s23 + $0xc] ss:$16 sps:$4 sm:$0xff]   ;;  %v1913_v26 = vpack.c.bf16 %v351_v14, %v350_v13  ;;  %v1915_v29 = vpack.c.bf16 %v369_v22, %v368_v20  ;;  %v1943_v34 = vld [vmem:[%s2287_s23] ss:$16 sps:$4 sm:$0xff]  }
  0x1b   : > { %1874 = vmatpush3.bf16.msra.mxu0 %v1873_v62  ;;  %v320_v25 = vld [vmem:[%s2594_s1 + $0x70] sm:$0xff]  ;;  %850 = vmatprep.mubr.bf16.mxu0 %v1945_v21  ;;  %v321_v28 = vld [vmem:[%s2594_s1 + $0x78] sm:$0xff] }
  0x1c   : > { %1906 = vmatpush3.bf16.msra.mxu1 %v1905_v0  ;;  %1876 = vmatprep.subr.bf16.mxu0 %v1875_v1  ;;  %v352_v30 = vld [vmem:[%s2594_s1 + $0x170] sm:$0xff]  ;;  %v353_v31 = vld [vmem:[%s2594_s1 + $0x178] sm:$0xff]  ;;  %v1885_v32 = vpack.c.bf16 %v321_v28, %v320_v25 }
  0x1d   : > { %1908 = vmatprep.subr.bf16.mxu1 %v1907_v5  ;;  %1043 = vmatprep.mubr.bf16.mxu1 %v1948_v23  ;;  %v1917_v33 = vpack.c.bf16 %v353_v31, %v352_v30  ;;  %v1946_v35 = vld [vmem:[%s2287_s23 + $0x8] ss:$16 sps:$4 sm:$0xff]   ;;  %v1949_v36 = vld [vmem:[%s2287_s23 + $0x24] ss:$16 sps:$4 sm:$0xff]   ;;  %v1951_v37 = vld [vmem:[%s2287_s23 + $0x2c] ss:$16 sps:$4 sm:$0xff]  }
  0x1e   : > { %v1953_v38 = vld [vmem:[%s2287_s23 + $0x20] ss:$16 sps:$4 sm:$0xff]   ;;  %v1954_v39 = vld [vmem:[%s2287_s23 + $0x28] ss:$16 sps:$4 sm:$0xff]   ;;  %v1955_v40 = vld [vmem:[%s2287_s23 + $0x44] ss:$16 sps:$4 sm:$0xff]  }
  0x1f   : > { %1878 = vmatpush3.bf16.msra.mxu0 %v1877_v12  ;;  %v1957_v41 = vld [vmem:[%s2287_s23 + $0x4c] ss:$16 sps:$4 sm:$0xff]   ;;  %v1959_v42 = vld [vmem:[%s2287_s23 + $0x40] ss:$16 sps:$4 sm:$0xff]   ;;  %v1960_v43 = vld [vmem:[%s2287_s23 + $0x48] ss:$16 sps:$4 sm:$0xff]  }
  0x20   : > { %1910 = vmatpush3.bf16.msra.mxu1 %v1909_v16  ;;  %1880 = vmatprep.subr.bf16.mxu0 %v1879_v17  ;;  %v1961_v44 = vld [vmem:[%s2287_s23 + $0x64] ss:$16 sps:$4 sm:$0xff]   ;;  %v1963_v45 = vld [vmem:[%s2287_s23 + $0x6c] ss:$16 sps:$4 sm:$0xff]   ;;  %v1965_v46 = vld [vmem:[%s2287_s23 + $0x60] ss:$16 sps:$4 sm:$0xff]  }
  0x21   : > { %1912 = vmatprep.subr.bf16.mxu1 %v1911_v19  ;;  %v1966_v47 = vld [vmem:[%s2287_s23 + $0x68] ss:$16 sps:$4 sm:$0xff]   ;;  %v1967_v48 = vld [vmem:[%s2287_s23 + $0x84] ss:$16 sps:$4 sm:$0xff]   ;;  %v1969_v49 = vld [vmem:[%s2287_s23 + $0x8c] ss:$16 sps:$4 sm:$0xff]  }
  0x22   : > { %v1971_v50 = vld [vmem:[%s2287_s23 + $0x80] ss:$16 sps:$4 sm:$0xff]   ;;  %v1972_v51 = vld [vmem:[%s2287_s23 + $0x88] ss:$16 sps:$4 sm:$0xff]   ;;  %v1973_v52 = vld [vmem:[%s2287_s23 + $0xa4] ss:$16 sps:$4 sm:$0xff]  }
  0x23   : > { %1882 = vmatpush3.bf16.msra.mxu0 %v1881_v24  ;;  %v1975_v53 = vld [vmem:[%s2287_s23 + $0xac] ss:$16 sps:$4 sm:$0xff]   ;;  %v1977_v54 = vld [vmem:[%s2287_s23 + $0xa0] ss:$16 sps:$4 sm:$0xff]   ;;  %v1978_v55 = vld [vmem:[%s2287_s23 + $0xa8] ss:$16 sps:$4 sm:$0xff]  }
  0x24   : > { %1914 = vmatpush3.bf16.msra.mxu1 %v1913_v26  ;;  %1884 = vmatprep.subr.bf16.mxu0 %v1883_v27  ;;  %v1979_v56 = vld [vmem:[%s2287_s23 + $0xc4] ss:$16 sps:$4 sm:$0xff]   ;;  %v1981_v57 = vld [vmem:[%s2287_s23 + $0xcc] ss:$16 sps:$4 sm:$0xff]   ;;  %v1983_v58 = vld [vmem:[%s2287_s23 + $0xc0] ss:$16 sps:$4 sm:$0xff]  }
  0x25   : > { %1916 = vmatprep.subr.bf16.mxu1 %v1915_v29  ;;  %v1984_v59 = vld [vmem:[%s2287_s23 + $0xc8] ss:$16 sps:$4 sm:$0xff]   ;;  %v1985_v60 = vld [vmem:[%s2287_s23 + $0xe4] ss:$16 sps:$4 sm:$0xff]   ;;  %v1987_v61 = vld [vmem:[%s2287_s23 + $0xec] ss:$16 sps:$4 sm:$0xff]  }
  0x26   : > { %v1989_v62 = vld [vmem:[%s2287_s23 + $0xe0] ss:$16 sps:$4 sm:$0xff]   ;;  %v1990_v63 = vld [vmem:[%s2287_s23 + $0xe8] ss:$16 sps:$4 sm:$0xff]   ;;  %v1991_v0 = vld [vmem:[%s2287_s23 + $0x104] ss:$16 sps:$4 sm:$0xff]  }
  0x27   : > { %1886 = vmatpush3.bf16.msra.mxu0 %v1885_v32  ;;  %v1993_v1 = vld [vmem:[%s2287_s23 + $0x10c] ss:$16 sps:$4 sm:$0xff]   ;;  %v1995_v2 = vld [vmem:[%s2287_s23 + $0x100] ss:$16 sps:$4 sm:$0xff]   ;;  %v1996_v3 = vld [vmem:[%s2287_s23 + $0x108] ss:$16 sps:$4 sm:$0xff]  }
  0x28   : > { %1918 = vmatpush3.bf16.msra.mxu1 %v1917_v33  ;;  %v1997_v4 = vld [vmem:[%s2287_s23 + $0x124] ss:$16 sps:$4 sm:$0xff]   ;;  %v1999_v5 = vld [vmem:[%s2287_s23 + $0x12c] ss:$16 sps:$4 sm:$0xff]   ;;  %v2001_v6 = vld [vmem:[%s2287_s23 + $0x120] ss:$16 sps:$4 sm:$0xff]  }
  0x29   : > { %v2002_v7 = vld [vmem:[%s2287_s23 + $0x128] ss:$16 sps:$4 sm:$0xff]   ;;  %v2003_v8 = vld [vmem:[%s2287_s23 + $0x144] ss:$16 sps:$4 sm:$0xff]   ;;  %v2005_v9 = vld [vmem:[%s2287_s23 + $0x14c] ss:$16 sps:$4 sm:$0xff]  }
  0x2a   : > { %851 = vmatmul.mubr.bf16.vlgmr.msra.gmra.mrb[0].mxu0 %v1943_v34  ;;  %v2007_v10 = vld [vmem:[%s2287_s23 + $0x140] ss:$16 sps:$4 sm:$0xff]   ;;  %v2008_v11 = vld [vmem:[%s2287_s23 + $0x148] ss:$16 sps:$4 sm:$0xff]   ;;  %v2009_v12 = vld [vmem:[%s2287_s23 + $0x164] ss:$16 sps:$4 sm:$0xff]  }
  0x2b   : > { %1044 = vmatmul.mubr.bf16.vlgmr.msra.gmra.mrb[0].mxu1 %v1946_v35  ;;  %858 = vmatprep.mubr.bf16.mxu0 %v1949_v36  ;;  %v2011_v13 = vld [vmem:[%s2287_s23 + $0x16c] ss:$16 sps:$4 sm:$0xff]   ;;  %v2013_v14 = vld [vmem:[%s2287_s23 + $0x160] ss:$16 sps:$4 sm:$0xff]   ;;  %v2014_v15 = vld [vmem:[%s2287_s23 + $0x168] ss:$16 sps:$4 sm:$0xff]  }
  0x2c   : > { %1051 = vmatprep.mubr.bf16.mxu1 %v1951_v37  ;;  %v2015_v16 = vld [vmem:[%s2287_s23 + $0x184] ss:$16 sps:$4 sm:$0xff]   ;;  %v2017_v17 = vld [vmem:[%s2287_s23 + $0x18c] ss:$16 sps:$4 sm:$0xff]   ;;  %v2019_v18 = vld [vmem:[%s2287_s23 + $0x180] ss:$16 sps:$4 sm:$0xff]  }
  0x2d   : > { %v2020_v19 = vld [vmem:[%s2287_s23 + $0x188] ss:$16 sps:$4 sm:$0xff]   ;;  %v2021_v20 = vld [vmem:[%s2287_s23 + $0x1a4] ss:$16 sps:$4 sm:$0xff]   ;;  %v2023_v21 = vld [vmem:[%s2287_s23 + $0x1ac] ss:$16 sps:$4 sm:$0xff]  }
  0x2e   : > { %v2025_v22 = vld [vmem:[%s2287_s23 + $0x1a0] ss:$16 sps:$4 sm:$0xff]   ;;  %v2026_v23 = vld [vmem:[%s2287_s23 + $0x1a8] ss:$16 sps:$4 sm:$0xff]   ;;  %v2027_v24 = vld [vmem:[%s2287_s23 + $0x1c4] ss:$16 sps:$4 sm:$0xff]  }
  0x2f   : > { %v2029_v25 = vld [vmem:[%s2287_s23 + $0x1cc] ss:$16 sps:$4 sm:$0xff]   ;;  %v2031_v26 = vld [vmem:[%s2287_s23 + $0x1c0] ss:$16 sps:$4 sm:$0xff]   ;;  %v2032_v27 = vld [vmem:[%s2287_s23 + $0x1c8] ss:$16 sps:$4 sm:$0xff]  }
  0x30   : > { %v2033_v28 = vld [vmem:[%s2287_s23 + $0x1e4] ss:$16 sps:$4 sm:$0xff]   ;;  %v2035_v29 = vld [vmem:[%s2287_s23 + $0x1ec] ss:$16 sps:$4 sm:$0xff]   ;;  %v2037_v30 = vld [vmem:[%s2287_s23 + $0x1e0] ss:$16 sps:$4 sm:$0xff]  }
  0x31   : > { %v2038_v31 = vld [vmem:[%s2287_s23 + $0x1e8] ss:$16 sps:$4 sm:$0xff]  }
  0x32   : > { %859 = vmatmul.mubr.bf16.gmra.mrb[4].mxu0 %v1953_v38 }
  0x33   : > { %1052 = vmatmul.mubr.bf16.gmra.mrb[4].mxu1 %v1954_v39  ;;  %866 = vmatprep.mubr.bf16.mxu0 %v1955_v40  ;;  %v1303_v39 = vld [vmem:[%s2390_s27] sm:$0xff] }
  0x34   : > { %1059 = vmatprep.mubr.bf16.mxu1 %v1957_v41 }
  0x3a   : > { %867 = vmatmul.mubr.bf16.gmra.mrb[8].mxu0 %v1959_v42 }
  0x3b   : > { %1060 = vmatmul.mubr.bf16.gmra.mrb[8].mxu1 %v1960_v43  ;;  %874 = vmatprep.mubr.bf16.mxu0 %v1961_v44  ;;  %v1304_v44 = vld [vmem:[%s2390_s27 + $0x8] sm:$0xff] }
  0x3c   : > { %1067 = vmatprep.mubr.bf16.mxu1 %v1963_v45  ;;  %v1305_v45 = vld [vmem:[%s2390_s27 + $0x10] sm:$0xff] }
  0x42   : > { %875 = vmatmul.mubr.bf16.gmra.mrb[12].mxu0 %v1965_v46  ;;  %v1306_v46 = vld [vmem:[%s2390_s27 + $0x18] sm:$0xff] }
  0x43   : > { %1068 = vmatmul.mubr.bf16.gmra.mrb[12].mxu1 %v1966_v47  ;;  %882 = vmatprep.mubr.bf16.mxu0 %v1967_v48  ;;  %v2403_v47 = vld [vmem:[%s2390_s27 + $0x20] sm:$0xff]  ;;  %v2406_v48 = vld [vmem:[%s2390_s27 + $0x28] sm:$0xff] }
  0x44   : > { %1075 = vmatprep.mubr.bf16.mxu1 %v1969_v49  ;;  %v2409_v49 = vld [vmem:[%s2390_s27 + $0x30] sm:$0xff] }
  0x4a   : > { %883 = vmatmul.mubr.bf16.gmra.mrb[16].mxu0 %v1971_v50  ;;  %v2412_v50 = vld [vmem:[%s2390_s27 + $0x38] sm:$0xff] }
  0x4b   : > { %1076 = vmatmul.mubr.bf16.gmra.mrb[16].mxu1 %v1972_v51  ;;  %890 = vmatprep.mubr.bf16.mxu0 %v1973_v52  ;;  %v2415_v51 = vld [vmem:[%s2390_s27 + $0x40] sm:$0xff]  ;;  %v2418_v52 = vld [vmem:[%s2390_s27 + $0x48] sm:$0xff] }
  0x4c   : > { %1083 = vmatprep.mubr.bf16.mxu1 %v1975_v53  ;;  %v2421_v53 = vld [vmem:[%s2390_s27 + $0x50] sm:$0xff] }
  0x52   : > { %891 = vmatmul.mubr.bf16.gmra.mrb[20].mxu0 %v1977_v54  ;;  %v2424_v54 = vld [vmem:[%s2390_s27 + $0x58] sm:$0xff] }
  0x53   : > { %1084 = vmatmul.mubr.bf16.gmra.mrb[20].mxu1 %v1978_v55  ;;  %898 = vmatprep.mubr.bf16.mxu0 %v1979_v56  ;;  %v2427_v55 = vld [vmem:[%s2390_s27 + $0x60] sm:$0xff]  ;;  %v2430_v56 = vld [vmem:[%s2390_s27 + $0x68] sm:$0xff] }
  0x54   : > { %1091 = vmatprep.mubr.bf16.mxu1 %v1981_v57  ;;  %v2433_v57 = vld [vmem:[%s2390_s27 + $0x70] sm:$0xff] }
  0x5a   : > { %899 = vmatmul.mubr.bf16.gmra.mrb[24].mxu0 %v1983_v58  ;;  %v2436_v58 = vld [vmem:[%s2390_s27 + $0x78] sm:$0xff] }
  0x5b   : > { %1092 = vmatmul.mubr.bf16.gmra.mrb[24].mxu1 %v1984_v59  ;;  %906 = vmatprep.mubr.bf16.mxu0 %v1985_v60  ;;  %v2439_v59 = vld [vmem:[%s2390_s27 + $0x80] sm:$0xff]  ;;  %v2442_v60 = vld [vmem:[%s2390_s27 + $0x88] sm:$0xff] }
  0x5c   : > { %1099 = vmatprep.mubr.bf16.mxu1 %v1987_v61  ;;  %v2445_v61 = vld [vmem:[%s2390_s27 + $0x90] sm:$0xff] }
  0x62   : > { %907 = vmatmul.mubr.bf16.gmra.mrb[28].mxu0 %v1989_v62  ;;  %v2448_v62 = vld [vmem:[%s2390_s27 + $0x98] sm:$0xff] }
  0x63   : > { %1100 = vmatmul.mubr.bf16.gmra.mrb[28].mxu1 %v1990_v63  ;;  %914 = vmatprep.mubr.bf16.mxu0 %v1991_v0  ;;  %v2451_v63 = vld [vmem:[%s2390_s27 + $0xa0] sm:$0xff]  ;;  %v2454_v0 = vld [vmem:[%s2390_s27 + $0xa8] sm:$0xff] }
  0x64   : > { %1107 = vmatprep.mubr.bf16.mxu1 %v1993_v1  ;;  %v2457_v1 = vld [vmem:[%s2390_s27 + $0xb0] sm:$0xff] }
  0x6a   : > { %915 = vmatmul.mubr.bf16.gmra.mrb[32].mxu0 %v1995_v2  ;;  %v2460_v2 = vld [vmem:[%s2390_s27 + $0xb8] sm:$0xff] }
  0x6b   : > { %1108 = vmatmul.mubr.bf16.gmra.mrb[32].mxu1 %v1996_v3  ;;  %922 = vmatprep.mubr.bf16.mxu0 %v1997_v4  ;;  %v2463_v3 = vld [vmem:[%s2390_s27 + $0xc0] sm:$0xff]  ;;  %v2466_v4 = vld [vmem:[%s2390_s27 + $0xc8] sm:$0xff] }
  0x6c   : > { %1115 = vmatprep.mubr.bf16.mxu1 %v1999_v5 }
  0x72   : > { %923 = vmatmul.mubr.bf16.gmra.mrb[36].mxu0 %v2001_v6 }
  0x73   : > { %1116 = vmatmul.mubr.bf16.gmra.mrb[36].mxu1 %v2002_v7  ;;  %930 = vmatprep.mubr.bf16.mxu0 %v2003_v8  ;;  %v2469_v7 = vld [vmem:[%s2390_s27 + $0xd0] sm:$0xff]  ;;  %v2472_v8 = vld [vmem:[%s2390_s27 + $0xd8] sm:$0xff] }
  0x74   : > { %1123 = vmatprep.mubr.bf16.mxu1 %v2005_v9  ;;  %v2475_v9 = vld [vmem:[%s2390_s27 + $0xe0] sm:$0xff] }
  0x7a   : > { %931 = vmatmul.mubr.bf16.gmra.mrb[40].mxu0 %v2007_v10  ;;  %v2484_v10 = vld [vmem:[%s2390_s27 + $0xe8] sm:$0xff] }
  0x7b   : > { %1124 = vmatmul.mubr.bf16.gmra.mrb[40].mxu1 %v2008_v11  ;;  %938 = vmatprep.mubr.bf16.mxu0 %v2009_v12  ;;  %v2487_v11 = vld [vmem:[%s2390_s27 + $0xf0] sm:$0xff]  ;;  %v2490_v12 = vld [vmem:[%s2390_s27 + $0xf8] sm:$0xff] }
  0x7c   : > { %1131 = vmatprep.mubr.bf16.mxu1 %v2011_v13 }
  0x82   : > { %939 = vmatmul.mubr.bf16.gmra.mrb[44].mxu0 %v2013_v14 }
  0x83   : > { %1132 = vmatmul.mubr.bf16.gmra.mrb[44].mxu1 %v2014_v15  ;;  %946 = vmatprep.mubr.bf16.mxu0 %v2015_v16 }
  0x84   : > { %1139 = vmatprep.mubr.bf16.mxu1 %v2017_v17 }
  0x8a   : > { %947 = vmatmul.mubr.bf16.gmra.mrb[48].mxu0 %v2019_v18 }
  0x8b   : > { %1140 = vmatmul.mubr.bf16.gmra.mrb[48].mxu1 %v2020_v19  ;;  %954 = vmatprep.mubr.bf16.mxu0 %v2021_v20 }
  0x8c   : > { %1147 = vmatprep.mubr.bf16.mxu1 %v2023_v21 }
  0x92   : > { %955 = vmatmul.mubr.bf16.gmra.mrb[52].mxu0 %v2025_v22 }
  0x93   : > { %1148 = vmatmul.mubr.bf16.gmra.mrb[52].mxu1 %v2026_v23  ;;  %962 = vmatprep.mubr.bf16.mxu0 %v2027_v24 }
  0x94   : > { %1155 = vmatprep.mubr.bf16.mxu1 %v2029_v25 }
  0x9a   : > { %963 = vmatmul.mubr.bf16.gmra.mrb[56].mxu0 %v2031_v26 }
  0x9b   : > { %1156 = vmatmul.mubr.bf16.gmra.mrb[56].mxu1 %v2032_v27  ;;  %970 = vmatprep.mubr.bf16.mxu0 %v2033_v28 }
  0x9c   : > { %1163 = vmatprep.mubr.bf16.mxu1 %v2035_v29 }
  0xa2   : > { %971 = vmatmul.mubr.bf16.gmra.mrb[60].mxu0 %v2037_v30 }
  0xa3   : > { %1164 = vmatmul.mubr.bf16.gmra.mrb[60].mxu1 %v2038_v31 }
  0xfd   : > { %v1631_v32 = vpop.f32.mrb[0].mxu0 }
  0xfe   : > { %v1759_v33 = vpop.f32.mrb[0].mxu1  ;;  %v1632_v34 = vpop.f32.mrb[1].mxu0 }
  0xff   : > { %v1633_v35 = vadd.f32 %v1632_v34, %v1631_v32  ;;  %v1760_v36 = vpop.f32.mrb[1].mxu1  ;;  %v1634_v37 = vpop.f32.mrb[2].mxu0 }
 0x100   : > { %v1761_v38 = vadd.f32 %v1760_v36, %v1759_v33  ;;  %v1762_v40 = vpop.f32.mrb[2].mxu1  ;;  %v1635_v41 = vpop.f32.mrb[3].mxu0 }
 0x101   : > { %v1636_v42 = vadd.f32 %v1635_v41, %v1634_v37  ;;  %v1763_v43 = vpop.f32.mrb[3].mxu1 }
 0x102   : > { %v1046_v5 = vadd.f32 %v1761_v38, %v1633_v35  ;;  %v1764_v6 = vadd.f32 %v1763_v43, %v1762_v40 }
 0x104   : > { %1271 = vst [vmem:[%s2397_s28] sm:$0xff] %v1046_v5  ;;  %v1335_v13 = vadd.f32 %v1303_v39, %v1046_v5  ;;  %v1049_v14 = vadd.f32 %v1764_v6, %v1636_v42 }
 0x105   : > { %v1637_v15 = vpop.f32.mrb[4].mxu0 }
 0x106   : > { %1272 = vst [vmem:[%s2397_s28 + $0x8] sm:$0xff] %v1049_v14  ;;  %v1336_v16 = vadd.f32 %v1304_v44, %v1049_v14  ;;  %v1765_v17 = vpop.f32.mrb[4].mxu1  ;;  %v1638_v18 = vpop.f32.mrb[5].mxu0  ;;  %1367 = vst [vmem:[%s2481_s24] sm:$0xff] %v1335_v13 }
 0x107   : > { %v1639_v19 = vadd.f32 %v1638_v18, %v1637_v15  ;;  %v1766_v20 = vpop.f32.mrb[5].mxu1  ;;  %v1640_v21 = vpop.f32.mrb[6].mxu0 }
 0x108   : > { %v1767_v22 = vadd.f32 %v1766_v20, %v1765_v17  ;;  %v1768_v23 = vpop.f32.mrb[6].mxu1  ;;  %v1641_v24 = vpop.f32.mrb[7].mxu0  ;;  %1368 = vst [vmem:[%s2481_s24 + $0x8] sm:$0xff] %v1336_v16 }
 0x109   : > { %v1642_v25 = vadd.f32 %v1641_v24, %v1640_v21  ;;  %v1769_v26 = vpop.f32.mrb[7].mxu1 }
 0x10a   : > { %v1054_v27 = vadd.f32 %v1767_v22, %v1639_v19  ;;  %v1770_v28 = vadd.f32 %v1769_v26, %v1768_v23 }
 0x10c   : > { %1273 = vst [vmem:[%s2397_s28 + $0x10] sm:$0xff] %v1054_v27  ;;  %v1337_v29 = vadd.f32 %v1305_v45, %v1054_v27  ;;  %v1057_v30 = vadd.f32 %v1770_v28, %v1642_v25 }
 0x10d   : > { %v1643_v31 = vpop.f32.mrb[8].mxu0 }
 0x10e   : > { %1274 = vst [vmem:[%s2397_s28 + $0x18] sm:$0xff] %v1057_v30  ;;  %v1338_v32 = vadd.f32 %v1306_v46, %v1057_v30  ;;  %v1771_v33 = vpop.f32.mrb[8].mxu1  ;;  %v1644_v34 = vpop.f32.mrb[9].mxu0  ;;  %1369 = vst [vmem:[%s2481_s24 + $0x10] sm:$0xff] %v1337_v29 }
 0x10f   : > { %v1645_v35 = vadd.f32 %v1644_v34, %v1643_v31  ;;  %v1772_v36 = vpop.f32.mrb[9].mxu1  ;;  %v1646_v37 = vpop.f32.mrb[10].mxu0 }
 0x110   : > { %v1773_v38 = vadd.f32 %v1772_v36, %v1771_v33  ;;  %v1774_v39 = vpop.f32.mrb[10].mxu1  ;;  %v1647_v40 = vpop.f32.mrb[11].mxu0  ;;  %1370 = vst [vmem:[%s2481_s24 + $0x18] sm:$0xff] %v1338_v32 }
 0x111   : > { %v1648_v41 = vadd.f32 %v1647_v40, %v1646_v37  ;;  %v1775_v42 = vpop.f32.mrb[11].mxu1 }
 0x112   : > { %v1062_v43 = vadd.f32 %v1773_v38, %v1645_v35  ;;  %v1776_v44 = vadd.f32 %v1775_v42, %v1774_v39 }
 0x114   : > { %1275 = vst [vmem:[%s2397_s28 + $0x20] sm:$0xff] %v1062_v43  ;;  %v1339_v45 = vadd.f32 %v2403_v47, %v1062_v43  ;;  %v1065_v46 = vadd.f32 %v1776_v44, %v1648_v41 }
 0x115   : > { %v1649_v5 = vpop.f32.mrb[12].mxu0 }
 0x116   : > { %1276 = vst [vmem:[%s2397_s28 + $0x28] sm:$0xff] %v1065_v46  ;;  %v1340_v6 = vadd.f32 %v2406_v48, %v1065_v46  ;;  %v1777_v13 = vpop.f32.mrb[12].mxu1  ;;  %v1650_v14 = vpop.f32.mrb[13].mxu0  ;;  %1371 = vst [vmem:[%s2481_s24 + $0x20] sm:$0xff] %v1339_v45 }
 0x117   : > { %v1651_v15 = vadd.f32 %v1650_v14, %v1649_v5  ;;  %v1778_v16 = vpop.f32.mrb[13].mxu1  ;;  %v1652_v17 = vpop.f32.mrb[14].mxu0 }
 0x118   : > { %v1779_v18 = vadd.f32 %v1778_v16, %v1777_v13  ;;  %v1780_v19 = vpop.f32.mrb[14].mxu1  ;;  %v1653_v20 = vpop.f32.mrb[15].mxu0  ;;  %1372 = vst [vmem:[%s2481_s24 + $0x28] sm:$0xff] %v1340_v6 }
 0x119   : > { %v1654_v21 = vadd.f32 %v1653_v20, %v1652_v17  ;;  %v1781_v47 = vpop.f32.mrb[15].mxu1 }
 0x11a   : > { %v1070_v22 = vadd.f32 %v1779_v18, %v1651_v15  ;;  %v1782_v23 = vadd.f32 %v1781_v47, %v1780_v19 }
 0x11c   : > { %1277 = vst [vmem:[%s2397_s28 + $0x30] sm:$0xff] %v1070_v22  ;;  %v1341_v48 = vadd.f32 %v2409_v49, %v1070_v22  ;;  %v1073_v24 = vadd.f32 %v1782_v23, %v1654_v21 }
 0x11d   : > { %v1655_v25 = vpop.f32.mrb[16].mxu0 }
 0x11e   : > { %1278 = vst [vmem:[%s2397_s28 + $0x38] sm:$0xff] %v1073_v24  ;;  %v1342_v26 = vadd.f32 %v2412_v50, %v1073_v24  ;;  %v1783_v27 = vpop.f32.mrb[16].mxu1  ;;  %v1656_v28 = vpop.f32.mrb[17].mxu0  ;;  %1373 = vst [vmem:[%s2481_s24 + $0x30] sm:$0xff] %v1341_v48 }
 0x11f   : > { %v1657_v29 = vadd.f32 %v1656_v28, %v1655_v25  ;;  %v1784_v30 = vpop.f32.mrb[17].mxu1  ;;  %v1658_v31 = vpop.f32.mrb[18].mxu0 }
 0x120   : > { %v1785_v32 = vadd.f32 %v1784_v30, %v1783_v27  ;;  %v1786_v33 = vpop.f32.mrb[18].mxu1  ;;  %v1659_v34 = vpop.f32.mrb[19].mxu0  ;;  %1374 = vst [vmem:[%s2481_s24 + $0x38] sm:$0xff] %v1342_v26 }
 0x121   : > { %v1660_v35 = vadd.f32 %v1659_v34, %v1658_v31  ;;  %v1787_v49 = vpop.f32.mrb[19].mxu1 }
 0x122   : > { %v1078_v36 = vadd.f32 %v1785_v32, %v1657_v29  ;;  %v1788_v37 = vadd.f32 %v1787_v49, %v1786_v33 }
 0x124   : > { %1279 = vst [vmem:[%s2397_s28 + $0x40] sm:$0xff] %v1078_v36  ;;  %v1343_v50 = vadd.f32 %v2415_v51, %v1078_v36  ;;  %v1081_v38 = vadd.f32 %v1788_v37, %v1660_v35 }
 0x125   : > { %v1661_v39 = vpop.f32.mrb[20].mxu0 }
 0x126   : > { %1280 = vst [vmem:[%s2397_s28 + $0x48] sm:$0xff] %v1081_v38  ;;  %v1344_v40 = vadd.f32 %v2418_v52, %v1081_v38  ;;  %v1789_v41 = vpop.f32.mrb[20].mxu1  ;;  %v1662_v42 = vpop.f32.mrb[21].mxu0  ;;  %1375 = vst [vmem:[%s2481_s24 + $0x40] sm:$0xff] %v1343_v50 }
 0x127   : > { %v1663_v43 = vadd.f32 %v1662_v42, %v1661_v39  ;;  %v1790_v44 = vpop.f32.mrb[21].mxu1  ;;  %v1664_v45 = vpop.f32.mrb[22].mxu0 }
 0x128   : > { %v1791_v46 = vadd.f32 %v1790_v44, %v1789_v41  ;;  %v1792_v5 = vpop.f32.mrb[22].mxu1  ;;  %v1665_v6 = vpop.f32.mrb[23].mxu0  ;;  %1376 = vst [vmem:[%s2481_s24 + $0x48] sm:$0xff] %v1344_v40 }
 0x129   : > { %v1666_v13 = vadd.f32 %v1665_v6, %v1664_v45  ;;  %v1793_v51 = vpop.f32.mrb[23].mxu1 }
 0x12a   : > { %v1086_v14 = vadd.f32 %v1791_v46, %v1663_v43  ;;  %v1794_v15 = vadd.f32 %v1793_v51, %v1792_v5 }
 0x12c   : > { %1281 = vst [vmem:[%s2397_s28 + $0x50] sm:$0xff] %v1086_v14  ;;  %v1345_v52 = vadd.f32 %v2421_v53, %v1086_v14  ;;  %v1089_v16 = vadd.f32 %v1794_v15, %v1666_v13 }
 0x12d   : > { %v1667_v17 = vpop.f32.mrb[24].mxu0 }
 0x12e   : > { %1282 = vst [vmem:[%s2397_s28 + $0x58] sm:$0xff] %v1089_v16  ;;  %v1346_v18 = vadd.f32 %v2424_v54, %v1089_v16  ;;  %v1795_v19 = vpop.f32.mrb[24].mxu1  ;;  %v1668_v20 = vpop.f32.mrb[25].mxu0  ;;  %1377 = vst [vmem:[%s2481_s24 + $0x50] sm:$0xff] %v1345_v52 }
 0x12f   : > { %v1669_v21 = vadd.f32 %v1668_v20, %v1667_v17  ;;  %v1796_v47 = vpop.f32.mrb[25].mxu1  ;;  %v1670_v22 = vpop.f32.mrb[26].mxu0 }
 0x130   : > { %v1797_v23 = vadd.f32 %v1796_v47, %v1795_v19  ;;  %v1798_v48 = vpop.f32.mrb[26].mxu1  ;;  %v1671_v24 = vpop.f32.mrb[27].mxu0  ;;  %1378 = vst [vmem:[%s2481_s24 + $0x58] sm:$0xff] %v1346_v18 }
 0x131   : > { %v1672_v25 = vadd.f32 %v1671_v24, %v1670_v22  ;;  %v1799_v53 = vpop.f32.mrb[27].mxu1 }
 0x132   : > { %v1094_v26 = vadd.f32 %v1797_v23, %v1669_v21  ;;  %v1800_v27 = vadd.f32 %v1799_v53, %v1798_v48 }
 0x134   : > { %1283 = vst [vmem:[%s2397_s28 + $0x60] sm:$0xff] %v1094_v26  ;;  %v1347_v54 = vadd.f32 %v2427_v55, %v1094_v26  ;;  %v1097_v28 = vadd.f32 %v1800_v27, %v1672_v25 }
 0x135   : > { %v1673_v29 = vpop.f32.mrb[28].mxu0 }
 0x136   : > { %1284 = vst [vmem:[%s2397_s28 + $0x68] sm:$0xff] %v1097_v28  ;;  %v1348_v30 = vadd.f32 %v2430_v56, %v1097_v28  ;;  %v1801_v31 = vpop.f32.mrb[28].mxu1  ;;  %v1674_v32 = vpop.f32.mrb[29].mxu0  ;;  %1379 = vst [vmem:[%s2481_s24 + $0x60] sm:$0xff] %v1347_v54 }
 0x137   : > { %v1675_v33 = vadd.f32 %v1674_v32, %v1673_v29  ;;  %v1802_v34 = vpop.f32.mrb[29].mxu1  ;;  %v1676_v35 = vpop.f32.mrb[30].mxu0 }
 0x138   : > { %v1803_v49 = vadd.f32 %v1802_v34, %v1801_v31  ;;  %v1804_v36 = vpop.f32.mrb[30].mxu1  ;;  %v1677_v37 = vpop.f32.mrb[31].mxu0  ;;  %1380 = vst [vmem:[%s2481_s24 + $0x68] sm:$0xff] %v1348_v30 }
 0x139   : > { %v1678_v50 = vadd.f32 %v1677_v37, %v1676_v35  ;;  %v1805_v55 = vpop.f32.mrb[31].mxu1 }
 0x13a   : > { %v1102_v38 = vadd.f32 %v1803_v49, %v1675_v33  ;;  %v1806_v39 = vadd.f32 %v1805_v55, %v1804_v36 }
 0x13c   : > { %1285 = vst [vmem:[%s2397_s28 + $0x70] sm:$0xff] %v1102_v38  ;;  %v1349_v56 = vadd.f32 %v2433_v57, %v1102_v38  ;;  %v1105_v40 = vadd.f32 %v1806_v39, %v1678_v50 }
 0x13d   : > { %v1679_v41 = vpop.f32.mrb[32].mxu0 }
 0x13e   : > { %1286 = vst [vmem:[%s2397_s28 + $0x78] sm:$0xff] %v1105_v40  ;;  %v1350_v42 = vadd.f32 %v2436_v58, %v1105_v40  ;;  %v1807_v43 = vpop.f32.mrb[32].mxu1  ;;  %v1680_v44 = vpop.f32.mrb[33].mxu0  ;;  %1381 = vst [vmem:[%s2481_s24 + $0x70] sm:$0xff] %v1349_v56 }
 0x13f   : > { %v1681_v45 = vadd.f32 %v1680_v44, %v1679_v41  ;;  %v1808_v46 = vpop.f32.mrb[33].mxu1  ;;  %v1682_v5 = vpop.f32.mrb[34].mxu0 }
 0x140   : > { %v1809_v6 = vadd.f32 %v1808_v46, %v1807_v43  ;;  %v1810_v13 = vpop.f32.mrb[34].mxu1  ;;  %v1683_v51 = vpop.f32.mrb[35].mxu0  ;;  %1382 = vst [vmem:[%s2481_s24 + $0x78] sm:$0xff] %v1350_v42 }
 0x141   : > { %v1684_v14 = vadd.f32 %v1683_v51, %v1682_v5  ;;  %v1811_v57 = vpop.f32.mrb[35].mxu1 }
 0x142   : > { %v1110_v15 = vadd.f32 %v1809_v6, %v1681_v45  ;;  %v1812_v52 = vadd.f32 %v1811_v57, %v1810_v13 }
 0x144   : > { %1287 = vst [vmem:[%s2397_s28 + $0x80] sm:$0xff] %v1110_v15  ;;  %v1351_v58 = vadd.f32 %v2439_v59, %v1110_v15  ;;  %v1113_v16 = vadd.f32 %v1812_v52, %v1684_v14 }
 0x145   : > { %v1685_v17 = vpop.f32.mrb[36].mxu0 }
 0x146   : > { %1288 = vst [vmem:[%s2397_s28 + $0x88] sm:$0xff] %v1113_v16  ;;  %v1352_v18 = vadd.f32 %v2442_v60, %v1113_v16  ;;  %v1813_v19 = vpop.f32.mrb[36].mxu1  ;;  %v1686_v20 = vpop.f32.mrb[37].mxu0  ;;  %1383 = vst [vmem:[%s2481_s24 + $0x80] sm:$0xff] %v1351_v58 }
 0x147   : > { %v1687_v21 = vadd.f32 %v1686_v20, %v1685_v17  ;;  %v1814_v47 = vpop.f32.mrb[37].mxu1  ;;  %v1688_v22 = vpop.f32.mrb[38].mxu0 }
 0x148   : > { %v1815_v23 = vadd.f32 %v1814_v47, %v1813_v19  ;;  %v1816_v48 = vpop.f32.mrb[38].mxu1  ;;  %v1689_v24 = vpop.f32.mrb[39].mxu0  ;;  %1384 = vst [vmem:[%s2481_s24 + $0x88] sm:$0xff] %v1352_v18 }
 0x149   : > { %v1690_v25 = vadd.f32 %v1689_v24, %v1688_v22  ;;  %v1817_v59 = vpop.f32.mrb[39].mxu1 }
 0x14a   : > { %v1118_v53 = vadd.f32 %v1815_v23, %v1687_v21  ;;  %v1818_v26 = vadd.f32 %v1817_v59, %v1816_v48 }
 0x14c   : > { %1289 = vst [vmem:[%s2397_s28 + $0x90] sm:$0xff] %v1118_v53  ;;  %v1353_v60 = vadd.f32 %v2445_v61, %v1118_v53  ;;  %v1121_v27 = vadd.f32 %v1818_v26, %v1690_v25 }
 0x14d   : > { %v1691_v54 = vpop.f32.mrb[40].mxu0 }
 0x14e   : > { %1290 = vst [vmem:[%s2397_s28 + $0x98] sm:$0xff] %v1121_v27  ;;  %v1354_v28 = vadd.f32 %v2448_v62, %v1121_v27  ;;  %v1819_v29 = vpop.f32.mrb[40].mxu1  ;;  %v1692_v30 = vpop.f32.mrb[41].mxu0  ;;  %1385 = vst [vmem:[%s2481_s24 + $0x90] sm:$0xff] %v1353_v60 }
 0x14f   : > { %v1693_v31 = vadd.f32 %v1692_v30, %v1691_v54  ;;  %v1820_v32 = vpop.f32.mrb[41].mxu1  ;;  %v1694_v33 = vpop.f32.mrb[42].mxu0 }
 0x150   : > { %v1821_v34 = vadd.f32 %v1820_v32, %v1819_v29  ;;  %v1822_v35 = vpop.f32.mrb[42].mxu1  ;;  %v1695_v49 = vpop.f32.mrb[43].mxu0  ;;  %1386 = vst [vmem:[%s2481_s24 + $0x98] sm:$0xff] %v1354_v28 }
 0x151   : > { %v1696_v36 = vadd.f32 %v1695_v49, %v1694_v33  ;;  %v1823_v61 = vpop.f32.mrb[43].mxu1 }
 0x152   : > { %v1126_v37 = vadd.f32 %v1821_v34, %v1693_v31  ;;  %v1824_v50 = vadd.f32 %v1823_v61, %v1822_v35 }
 0x154   : > { %1291 = vst [vmem:[%s2397_s28 + $0xa0] sm:$0xff] %v1126_v37  ;;  %v1355_v62 = vadd.f32 %v2451_v63, %v1126_v37  ;;  %v1129_v55 = vadd.f32 %v1824_v50, %v1696_v36 }
 0x155   : > { %v1697_v38 = vpop.f32.mrb[44].mxu0 }
 0x156   : > { %1292 = vst [vmem:[%s2397_s28 + $0xa8] sm:$0xff] %v1129_v55  ;;  %v1356_v39 = vadd.f32 %v2454_v0, %v1129_v55  ;;  %v1825_v56 = vpop.f32.mrb[44].mxu1  ;;  %v1698_v40 = vpop.f32.mrb[45].mxu0  ;;  %1387 = vst [vmem:[%s2481_s24 + $0xa0] sm:$0xff] %v1355_v62 }
 0x157   : > { %v1699_v41 = vadd.f32 %v1698_v40, %v1697_v38  ;;  %v1826_v42 = vpop.f32.mrb[45].mxu1  ;;  %v1700_v43 = vpop.f32.mrb[46].mxu0 }
 0x158   : > { %v1827_v44 = vadd.f32 %v1826_v42, %v1825_v56  ;;  %v1828_v45 = vpop.f32.mrb[46].mxu1  ;;  %v1701_v46 = vpop.f32.mrb[47].mxu0  ;;  %1388 = vst [vmem:[%s2481_s24 + $0xa8] sm:$0xff] %v1356_v39 }
 0x159   : > { %v1702_v5 = vadd.f32 %v1701_v46, %v1700_v43  ;;  %v1829_v63 = vpop.f32.mrb[47].mxu1 }
 0x15a   : > { %v1134_v6 = vadd.f32 %v1827_v44, %v1699_v41  ;;  %v1830_v13 = vadd.f32 %v1829_v63, %v1828_v45 }
 0x15c   : > { %1293 = vst [vmem:[%s2397_s28 + $0xb0] sm:$0xff] %v1134_v6  ;;  %v1357_v0 = vadd.f32 %v2457_v1, %v1134_v6  ;;  %v1137_v51 = vadd.f32 %v1830_v13, %v1702_v5 }
 0x15d   : > { %v1703_v14 = vpop.f32.mrb[48].mxu0 }
 0x15e   : > { %1294 = vst [vmem:[%s2397_s28 + $0xb8] sm:$0xff] %v1137_v51  ;;  %v1358_v57 = vadd.f32 %v2460_v2, %v1137_v51  ;;  %v1831_v15 = vpop.f32.mrb[48].mxu1  ;;  %v1704_v52 = vpop.f32.mrb[49].mxu0  ;;  %1389 = vst [vmem:[%s2481_s24 + $0xb0] sm:$0xff] %v1357_v0 }
 0x15f   : > { %v1705_v58 = vadd.f32 %v1704_v52, %v1703_v14  ;;  %v1832_v16 = vpop.f32.mrb[49].mxu1  ;;  %v1706_v17 = vpop.f32.mrb[50].mxu0 }
 0x160   : > { %v1833_v18 = vadd.f32 %v1832_v16, %v1831_v15  ;;  %v1834_v19 = vpop.f32.mrb[50].mxu1  ;;  %v1707_v20 = vpop.f32.mrb[51].mxu0  ;;  %1390 = vst [vmem:[%s2481_s24 + $0xb8] sm:$0xff] %v1358_v57 }
 0x161   : > { %v1708_v21 = vadd.f32 %v1707_v20, %v1706_v17  ;;  %v1835_v1 = vpop.f32.mrb[51].mxu1 }
 0x162   : > { %v1142_v47 = vadd.f32 %v1833_v18, %v1705_v58  ;;  %v1836_v22 = vadd.f32 %v1835_v1, %v1834_v19 }
 0x164   : > { %1295 = vst [vmem:[%s2397_s28 + $0xc0] sm:$0xff] %v1142_v47  ;;  %v1359_v2 = vadd.f32 %v2463_v3, %v1142_v47  ;;  %v1145_v23 = vadd.f32 %v1836_v22, %v1708_v21 }
 0x165   : > { %v1709_v48 = vpop.f32.mrb[52].mxu0 }
 0x166   : > { %1296 = vst [vmem:[%s2397_s28 + $0xc8] sm:$0xff] %v1145_v23  ;;  %v1360_v24 = vadd.f32 %v2466_v4, %v1145_v23  ;;  %v1837_v25 = vpop.f32.mrb[52].mxu1  ;;  %v1710_v59 = vpop.f32.mrb[53].mxu0  ;;  %1391 = vst [vmem:[%s2481_s24 + $0xc0] sm:$0xff] %v1359_v2 }
 0x167   : > { %v1711_v53 = vadd.f32 %v1710_v59, %v1709_v48  ;;  %v1838_v26 = vpop.f32.mrb[53].mxu1  ;;  %v1712_v60 = vpop.f32.mrb[54].mxu0 }
 0x168   : > { %v1839_v27 = vadd.f32 %v1838_v26, %v1837_v25  ;;  %v1840_v54 = vpop.f32.mrb[54].mxu1  ;;  %v1713_v28 = vpop.f32.mrb[55].mxu0  ;;  %1392 = vst [vmem:[%s2481_s24 + $0xc8] sm:$0xff] %v1360_v24 }
 0x169   : > { %v1714_v29 = vadd.f32 %v1713_v28, %v1712_v60  ;;  %v1841_v3 = vpop.f32.mrb[55].mxu1 }
 0x16a   : > { %v1150_v30 = vadd.f32 %v1839_v27, %v1711_v53  ;;  %v1842_v31 = vadd.f32 %v1841_v3, %v1840_v54 }
 0x16c   : > { %1297 = vst [vmem:[%s2397_s28 + $0xd0] sm:$0xff] %v1150_v30  ;;  %v1361_v4 = vadd.f32 %v2469_v7, %v1150_v30  ;;  %v1153_v32 = vadd.f32 %v1842_v31, %v1714_v29 }
 0x16d   : > { %v1715_v33 = vpop.f32.mrb[56].mxu0 }
 0x16e   : > { %1298 = vst [vmem:[%s2397_s28 + $0xd8] sm:$0xff] %v1153_v32  ;;  %v1362_v34 = vadd.f32 %v2472_v8, %v1153_v32  ;;  %v1843_v35 = vpop.f32.mrb[56].mxu1  ;;  %v1716_v49 = vpop.f32.mrb[57].mxu0  ;;  %1393 = vst [vmem:[%s2481_s24 + $0xd0] sm:$0xff] %v1361_v4 }
 0x16f   : > { %v1717_v36 = vadd.f32 %v1716_v49, %v1715_v33  ;;  %v1844_v61 = vpop.f32.mrb[57].mxu1  ;;  %v1718_v37 = vpop.f32.mrb[58].mxu0 }
 0x170   : > { %v1845_v50 = vadd.f32 %v1844_v61, %v1843_v35  ;;  %v1846_v62 = vpop.f32.mrb[58].mxu1  ;;  %v1719_v55 = vpop.f32.mrb[59].mxu0  ;;  %1394 = vst [vmem:[%s2481_s24 + $0xd8] sm:$0xff] %v1362_v34 }
 0x171   : > { %v1720_v38 = vadd.f32 %v1719_v55, %v1718_v37  ;;  %v1847_v7 = vpop.f32.mrb[59].mxu1 }
 0x172   : > { %v1158_v39 = vadd.f32 %v1845_v50, %v1717_v36  ;;  %v1848_v56 = vadd.f32 %v1847_v7, %v1846_v62 }
 0x174   : > { %1299 = vst [vmem:[%s2397_s28 + $0xe0] sm:$0xff] %v1158_v39  ;;  %v1363_v8 = vadd.f32 %v2475_v9, %v1158_v39  ;;  %v1161_v40 = vadd.f32 %v1848_v56, %v1720_v38 }
 0x175   : > { %v1721_v41 = vpop.f32.mrb[60].mxu0 }
 0x176   : > { %1300 = vst [vmem:[%s2397_s28 + $0xe8] sm:$0xff] %v1161_v40  ;;  %v1364_v42 = vadd.f32 %v2484_v10, %v1161_v40  ;;  %v1849_v43 = vpop.f32.mrb[60].mxu1  ;;  %v1722_v44 = vpop.f32.mrb[61].mxu0  ;;  %1395 = vst [vmem:[%s2481_s24 + $0xe0] sm:$0xff] %v1363_v8 }
 0x177   : > { %v1723_v45 = vadd.f32 %v1722_v44, %v1721_v41  ;;  %v1850_v46 = vpop.f32.mrb[61].mxu1  ;;  %v1724_v5 = vpop.f32.mrb[62].mxu0 }
 0x178   : > { %v1851_v63 = vadd.f32 %v1850_v46, %v1849_v43  ;;  %v1852_v6 = vpop.f32.mrb[62].mxu1  ;;  %v1725_v13 = vpop.f32.mrb[63].mxu0  ;;  %1396 = vst [vmem:[%s2481_s24 + $0xe8] sm:$0xff] %v1364_v42 }
 0x179   : > { %v1726_v9 = vadd.f32 %v1725_v13, %v1724_v5  ;;  %v1853_v0 = vpop.f32.mrb[63].mxu1 }
 0x17a   : > { %v1166_v51 = vadd.f32 %v1851_v63, %v1723_v45  ;;  %v1854_v14 = vadd.f32 %v1853_v0, %v1852_v6 }
 0x17c   : > { %1301 = vst [vmem:[%s2397_s28 + $0xf0] sm:$0xff] %v1166_v51  ;;  %v1365_v10 = vadd.f32 %v2487_v11, %v1166_v51  ;;  %v1169_v57 = vadd.f32 %v1854_v14, %v1726_v9 }
 0x17e   : > { %1302 = vst [vmem:[%s2397_s28 + $0xf8] sm:$0xff] %v1169_v57  ;;  %v1366_v15 = vadd.f32 %v2490_v12, %v1169_v57  ;;  %1397 = vst [vmem:[%s2481_s24 + $0xf0] sm:$0xff] %v1365_v10 }
 0x180   : > { %1398 = vst [vmem:[%s2481_s24 + $0xf8] sm:$0xff] %v1366_v15 }
 0x181 PF: > { %s15_s17 = sadd.s32 1, %s2061_s17   ;;  %s2599_s15 = smov %s2057_s16 }
 0x182   : > { %p12_p5 = scmp.ge.s32.totalorder %s15_s17, 4   ;;  %s2600_s16 = smov %s2602_s18 }
 0x184   :  { %14 = sbr.rel (!%p12_p5) target bundleno = 2 (0x2), region = 86 }

// kernel: lightgcn_forward_pallas.7
= control target key start
LH: loop header
LB: loop body
LE: loop exit
PB: predicated region body
PF: predicated region fallthrough
CT: control target
= control target key end

     0   :  { %10 = vsyncpa [#allocation4], 0  ;;  %s2790_s0 = inlined_call_operand.vmem [shape: bf16[512,512], index: 0, kind: input, shape index: {}]   ;;  %s2791_s1 = inlined_call_operand.vmem [shape: f32[512,128], index: 1, kind: input, shape index: {}]   ;;  %s2792_s2 = inlined_call_operand.vmem [shape: f32[512,128], index: 2, kind: input, shape index: {}, may-alias: {2,4}]   ;;  %s2793_s3 = inlined_call_operand.hbm [shape: f32[512,128], index: 3, kind: output, shape index: {0}]   ;;  %s2794_s4 = inlined_call_operand.vmem [shape: f32[512,128], index: 4, kind: output, shape index: {1}, may-alias: {2,4}]  }
   0x1   :  { %12 = vsyncpa [#allocation4 + $0x1], 0  ;;  %s2200_s15 = smov 0   ;;  %s2202_s16 = smov 0  }
   0x2   :  { %s2204_s17 = smov 0   ;;  %s2206_s18 = smov 0  }
   0x3   :  { %s2208_s19 = smov 0   ;;  %s2210_s20 = smov 0  }
   0x4 LB: > { %s1535_s21 = sadd.s32 4294967295, %s2170_s20   ;;  %s1536_s22 = sadd.s32 4294967294, %s2170_s20   ;;  %s2170_s20 = sphi %s2210_s20, %s18_s20   ;;  %s2166_s19 = sphi %s2208_s19, %s2802_s19   ;;  %s2162_s18 = sphi %s2206_s18, %s2801_s18   ;;  %s2158_s17 = sphi %s2204_s17, %s2800_s17   ;;  %s2154_s16 = sphi %s2202_s16, %s2799_s16   ;;  %s2150_s15 = sphi %s2200_s15, %s2798_s15  }
   0x5   : > { %s30_s23 = sadd.s32 1, %s2166_s19  ;;  %s112_s24 = sadd.s32 1, %s2158_s17 }
   0x6   : > { %p32_p0 = scmp.ge.s32.totalorder %s30_s23, 2  ;;  %p122_p1 = scmp.ne.s32.totalorder %s2158_s17, %s2154_s16 }
   0x7   : > { %p123_p2 = scmp.eq.s32.totalorder %s1535_s21, 1  ;;  %p128_p3 = scmp.ne.s32.totalorder %s2154_s16, %s2150_s15 }
   0x8   : > { %s2804_s23 = smov (%p32_p0, %s30_s23), 0  ;;  %p129_p5 = scmp.eq.s32.totalorder %s1536_s22, 1 }
   0x9   : > { %p2240_p4 = por %p123_p2, %p122_p1  ;;  %s109_s26 = ssub.s32 %s2166_s19, %s2804_s23 }
   0xa   : > { %p1539_p6 = scmp.ge.s32.totalorder %s2170_s20, 1  ;;  %p110_p7 = scmp.eq.s32.totalorder %s109_s26, 0 }
   0xb   : > { %p2247_p8 = por %p129_p5, %p128_p3  ;;  %p200_p9 = scmp.lt.s32.totalorder %s2170_s20, 3 }
   0xc   : > { %s2253_s28 = scalar_select %p110_p7, %s2158_s17, %s112_s24  }
   0xd   : > { %p201_p10 = pnand %p1539_p6, %p200_p9 }
   0xe   : > { %v320_v0 = vld [vmem:[%s2791_s1 + $0x80] sm:$0xff] (!%p201_p10)  ;;  %v321_v1 = vld [vmem:[%s2791_s1 + $0x88] sm:$0xff] (!%p201_p10)  ;;  %v322_v11 = vld [vmem:[%s2791_s1 + $0x90] sm:$0xff] (!%p201_p10)  ;;  %s1541_s7 = sshll.u32 (!%p201_p10), %s2162_s18, 5  ;;  %s231_s26 = sand.u32 (!%p201_p10), 1, %s2154_s16  }
   0xf   : > { %204 = sbr.rel (%p201_p10) target bundleno = 405 (0x195), region = 32  ;;  %v352_v2 = vld [vmem:[%s2791_s1 + $0x180] sm:$0xff] (!%p201_p10)  ;;  %v1875_v3 = vpack.c.bf16 (!%p201_p10), %v321_v1, %v320_v0  ;;  %v353_v4 = vld [vmem:[%s2791_s1 + $0x188] sm:$0xff] (!%p201_p10)  ;;  %v323_v13 = vld [vmem:[%s2791_s1 + $0x98] sm:$0xff] (!%p201_p10)  ;;  %p2339_p11 = scmp.lt.s32.totalorder (!%p201_p10), %s1541_s7, 63 }
  0x10   : > { %v304_v5 = vld [vmem:[%s2791_s1] sm:$0xff] (!%p201_p10)  ;;  %v305_v6 = vld [vmem:[%s2791_s1 + $0x8] sm:$0xff] (!%p201_p10)  ;;  %v1907_v7 = vpack.c.bf16 (!%p201_p10), %v353_v4, %v352_v2  ;;  %v354_v14 = vld [vmem:[%s2791_s1 + $0x190] sm:$0xff] (!%p201_p10)  ;;  %v1879_v16 = vpack.c.bf16 (!%p201_p10), %v323_v13, %v322_v11 }
  0x11   : > { %v1877_v8 = vpack.c.bf16 (!%p201_p10), %v305_v6, %v304_v5  ;;  %v336_v9 = vld [vmem:[%s2791_s1 + $0x100] sm:$0xff] (!%p201_p10)  ;;  %v337_v10 = vld [vmem:[%s2791_s1 + $0x108] sm:$0xff] (!%p201_p10)  ;;  %1876 = vmatprep.subr.bf16.mxu0 (!%p201_p10), %v1875_v3  ;;  %v355_v15 = vld [vmem:[%s2791_s1 + $0x198] sm:$0xff] (!%p201_p10) }
  0x12   : > { %v1909_v12 = vpack.c.bf16 (!%p201_p10), %v337_v10, %v336_v9  ;;  %1908 = vmatprep.subr.bf16.mxu1 (!%p201_p10), %v1907_v7  ;;  %v1911_v17 = vpack.c.bf16 (!%p201_p10), %v355_v15, %v354_v14  ;;  %v306_v18 = vld [vmem:[%s2791_s1 + $0x10] sm:$0xff] (!%p201_p10)  ;;  %v307_v19 = vld [vmem:[%s2791_s1 + $0x18] sm:$0xff] (!%p201_p10)  ;;  %v324_v23 = vld [vmem:[%s2791_s1 + $0xa0] sm:$0xff] (!%p201_p10) }
  0x13   : > { %1878 = vmatpush3.bf16.msra.mxu0 (!%p201_p10), %v1877_v8  ;;  %v338_v20 = vld [vmem:[%s2791_s1 + $0x110] sm:$0xff] (!%p201_p10)  ;;  %v1881_v21 = vpack.c.bf16 (!%p201_p10), %v307_v19, %v306_v18  ;;  %v339_v22 = vld [vmem:[%s2791_s1 + $0x118] sm:$0xff] (!%p201_p10)  ;;  %v325_v24 = vld [vmem:[%s2791_s1 + $0xa8] sm:$0xff] (!%p201_p10) }
  0x14   : > { %1910 = vmatpush3.bf16.msra.mxu1 (!%p201_p10), %v1909_v12  ;;  %1880 = vmatprep.subr.bf16.mxu0 (!%p201_p10), %v1879_v16  ;;  %v1913_v25 = vpack.c.bf16 (!%p201_p10), %v339_v22, %v338_v20  ;;  %v1883_v26 = vpack.c.bf16 (!%p201_p10), %v325_v24, %v324_v23  ;;  %v356_v27 = vld [vmem:[%s2791_s1 + $0x1a0] sm:$0xff] (!%p201_p10)  ;;  %v357_v28 = vld [vmem:[%s2791_s1 + $0x1a8] sm:$0xff] (!%p201_p10)  ;;  %v326_v35 = vld [vmem:[%s2791_s1 + $0xb0] sm:$0xff] (!%p201_p10) }
  0x15   : > { %1912 = vmatprep.subr.bf16.mxu1 (!%p201_p10), %v1911_v17  ;;  %v308_v29 = vld [vmem:[%s2791_s1 + $0x20] sm:$0xff] (!%p201_p10)  ;;  %v1915_v30 = vpack.c.bf16 (!%p201_p10), %v357_v28, %v356_v27  ;;  %v309_v31 = vld [vmem:[%s2791_s1 + $0x28] sm:$0xff] (!%p201_p10)  ;;  %v327_v36 = vld [vmem:[%s2791_s1 + $0xb8] sm:$0xff] (!%p201_p10) }
  0x16   : > { %v340_v32 = vld [vmem:[%s2791_s1 + $0x120] sm:$0xff]  ;;  %v341_v33 = vld [vmem:[%s2791_s1 + $0x128] sm:$0xff]  ;;  %v1885_v34 = vpack.c.bf16 %v309_v31, %v308_v29  ;;  %v358_v37 = vld [vmem:[%s2791_s1 + $0x1b0] sm:$0xff]  ;;  %v1887_v39 = vpack.c.bf16 %v327_v36, %v326_v35  ;;  %s2806_s7 = smov (!%p2339_p11, %s1541_s7), 63 }
  0x17   : > { %1882 = vmatpush3.bf16.msra.mxu0 %v1881_v21  ;;  %v1917_v38 = vpack.c.bf16 %v341_v33, %v340_v32  ;;  %v359_v40 = vld [vmem:[%s2791_s1 + $0x1b8] sm:$0xff]  ;;  %v310_v41 = vld [vmem:[%s2791_s1 + $0x30] sm:$0xff]  ;;  %v328_v46 = vld [vmem:[%s2791_s1 + $0xc0] sm:$0xff]  ;;  %s1617_s29 = sshll.u32 %s2806_s7, 4 }
  0x18   : > { %1914 = vmatpush3.bf16.msra.mxu1 %v1913_v25  ;;  %1884 = vmatprep.subr.bf16.mxu0 %v1883_v26  ;;  %v311_v42 = vld [vmem:[%s2791_s1 + $0x38] sm:$0xff]  ;;  %v1919_v43 = vpack.c.bf16 %v359_v40, %v358_v37  ;;  %v342_v44 = vld [vmem:[%s2791_s1 + $0x130] sm:$0xff]  ;;  %v329_v47 = vld [vmem:[%s2791_s1 + $0xc8] sm:$0xff]  ;;  %s2434_s10 = scalar_lea.vmem %s2790_s0, %s1617_s29  ;;  %s1545_s29 = sshll.u32 %s2806_s7, 3 }
  0x19   : > { %1916 = vmatprep.subr.bf16.mxu1 %v1915_v30  ;;  %v343_v45 = vld [vmem:[%s2791_s1 + $0x138] sm:$0xff]  ;;  %v360_v48 = vld [vmem:[%s2791_s1 + $0x1c0] sm:$0xff]  ;;  %v361_v49 = vld [vmem:[%s2791_s1 + $0x1c8] sm:$0xff]  ;;  %v1889_v50 = vpack.c.bf16 %v311_v42, %v310_v41  ;;  %v1891_v52 = vpack.c.bf16 %v329_v47, %v328_v46  ;;  %s2537_s11 = scalar_lea.vmem %s2792_s2, %s1545_s29  ;;  %s2627_s9 = scalar_lea.vmem %s2794_s4, %s1545_s29 }
  0x1a   : > { %v1921_v51 = vpack.c.bf16 %v343_v45, %v342_v44  ;;  %v312_v53 = vld [vmem:[%s2791_s1 + $0x40] sm:$0xff]  ;;  %v313_v54 = vld [vmem:[%s2791_s1 + $0x48] sm:$0xff]  ;;  %v1923_v56 = vpack.c.bf16 %v361_v49, %v360_v48  ;;  %v330_v58 = vld [vmem:[%s2791_s1 + $0xd0] sm:$0xff]  ;;  %s1618_s7 = sshll.u32 %s2162_s18, 12  ;;  %s2743_s18 = scalar_lea.sflag [#allocation4], %s231_s26 }
  0x1b   : > { %1886 = vmatpush3.bf16.msra.mxu0 %v1885_v34  ;;  %v344_v55 = vld [vmem:[%s2791_s1 + $0x140] sm:$0xff]  ;;  %v345_v57 = vld [vmem:[%s2791_s1 + $0x148] sm:$0xff]  ;;  %v331_v59 = vld [vmem:[%s2791_s1 + $0xd8] sm:$0xff]  ;;  %v1893_v62 = vpack.c.bf16 %v313_v54, %v312_v53  ;;  %s2732_s22 = scalar_lea.hbm %s2793_s3, %s1618_s7  ;;  %s2172_s29 = smov [#allocation3]  }
  0x1c   : > { %1918 = vmatpush3.bf16.msra.mxu1 %v1917_v38  ;;  %1888 = vmatprep.subr.bf16.mxu0 %v1887_v39  ;;  %v362_v60 = vld [vmem:[%s2791_s1 + $0x1d0] sm:$0xff]  ;;  %v363_v61 = vld [vmem:[%s2791_s1 + $0x1d8] sm:$0xff]  ;;  %v1925_v0 = vpack.c.bf16 %v345_v57, %v344_v55  ;;  %v1895_v1 = vpack.c.bf16 %v331_v59, %v330_v58  ;;  %v332_v6 = vld [vmem:[%s2791_s1 + $0xe0] sm:$0xff]  ;;  %s2096_s30 = sshll.u32 %s2172_s29, 4  ;;  %s2097_s30 = int_to_ptr.vmem [resolvable:$false] %s2096_s30 }
  0x1d   : > { %1920 = vmatprep.subr.bf16.mxu1 %v1919_v43  ;;  %v314_v63 = vld [vmem:[%s2791_s1 + $0x50] sm:$0xff]  ;;  %v315_v2 = vld [vmem:[%s2791_s1 + $0x58] sm:$0xff]  ;;  %v1927_v5 = vpack.c.bf16 %v363_v61, %v362_v60  ;;  %v333_v7 = vld [vmem:[%s2791_s1 + $0xe8] sm:$0xff]  ;;  %s2098_s5 = scalar_lea.vmem %s2097_s30, 8192 }
  0x1e   : > { %v346_v3 = vld [vmem:[%s2791_s1 + $0x150] sm:$0xff]  ;;  %v347_v4 = vld [vmem:[%s2791_s1 + $0x158] sm:$0xff]  ;;  %v364_v8 = vld [vmem:[%s2791_s1 + $0x1e0] sm:$0xff]  ;;  %v1897_v12 = vpack.c.bf16 %v315_v2, %v314_v63  ;;  %v1899_v17 = vpack.c.bf16 %v333_v7, %v332_v6 }
  0x1f   : > { %1890 = vmatpush3.bf16.msra.mxu0 %v1889_v50  ;;  %v365_v9 = vld [vmem:[%s2791_s1 + $0x1e8] sm:$0xff]  ;;  %v316_v10 = vld [vmem:[%s2791_s1 + $0x60] sm:$0xff]  ;;  %v334_v15 = vld [vmem:[%s2791_s1 + $0xf0] sm:$0xff]  ;;  %v1929_v16 = vpack.c.bf16 %v347_v4, %v346_v3 }
  0x20   : > { %1922 = vmatpush3.bf16.msra.mxu1 %v1921_v51  ;;  %1892 = vmatprep.subr.bf16.mxu0 %v1891_v52  ;;  %v317_v11 = vld [vmem:[%s2791_s1 + $0x68] sm:$0xff]  ;;  %v348_v13 = vld [vmem:[%s2791_s1 + $0x160] sm:$0xff]  ;;  %v335_v18 = vld [vmem:[%s2791_s1 + $0xf8] sm:$0xff]  ;;  %v1931_v19 = vpack.c.bf16 %v365_v9, %v364_v8 }
  0x21   : > { %1924 = vmatprep.subr.bf16.mxu1 %v1923_v56  ;;  %v349_v14 = vld [vmem:[%s2791_s1 + $0x168] sm:$0xff]  ;;  %v366_v20 = vld [vmem:[%s2791_s1 + $0x1f0] sm:$0xff]  ;;  %v367_v22 = vld [vmem:[%s2791_s1 + $0x1f8] sm:$0xff]  ;;  %v1901_v24 = vpack.c.bf16 %v317_v11, %v316_v10  ;;  %v1903_v27 = vpack.c.bf16 %v335_v18, %v334_v15 }
  0x22   : > { %v1998_v21 = vld [vmem:[%s2434_s10 + $0x4] ss:$16 sps:$4 sm:$0xff]   ;;  %v2001_v23 = vld [vmem:[%s2434_s10 + $0xc] ss:$16 sps:$4 sm:$0xff]   ;;  %v1933_v26 = vpack.c.bf16 %v349_v14, %v348_v13  ;;  %v1935_v29 = vpack.c.bf16 %v367_v22, %v366_v20  ;;  %v1996_v34 = vld [vmem:[%s2434_s10] ss:$16 sps:$4 sm:$0xff]  }
  0x23   : > { %1894 = vmatpush3.bf16.msra.mxu0 %v1893_v62  ;;  %v318_v25 = vld [vmem:[%s2791_s1 + $0x70] sm:$0xff]  ;;  %848 = vmatprep.mubr.bf16.mxu0 %v1998_v21  ;;  %v319_v28 = vld [vmem:[%s2791_s1 + $0x78] sm:$0xff] }
  0x24   : > { %1926 = vmatpush3.bf16.msra.mxu1 %v1925_v0  ;;  %1896 = vmatprep.subr.bf16.mxu0 %v1895_v1  ;;  %v350_v30 = vld [vmem:[%s2791_s1 + $0x170] sm:$0xff]  ;;  %v351_v31 = vld [vmem:[%s2791_s1 + $0x178] sm:$0xff]  ;;  %v1905_v32 = vpack.c.bf16 %v319_v28, %v318_v25 }
  0x25   : > { %1928 = vmatprep.subr.bf16.mxu1 %v1927_v5  ;;  %1041 = vmatprep.mubr.bf16.mxu1 %v2001_v23  ;;  %v1937_v33 = vpack.c.bf16 %v351_v31, %v350_v30  ;;  %v1999_v35 = vld [vmem:[%s2434_s10 + $0x8] ss:$16 sps:$4 sm:$0xff]   ;;  %v2002_v36 = vld [vmem:[%s2434_s10 + $0x24] ss:$16 sps:$4 sm:$0xff]   ;;  %v2004_v37 = vld [vmem:[%s2434_s10 + $0x2c] ss:$16 sps:$4 sm:$0xff]  }
  0x26   : > { %v2006_v38 = vld [vmem:[%s2434_s10 + $0x20] ss:$16 sps:$4 sm:$0xff]   ;;  %v2007_v39 = vld [vmem:[%s2434_s10 + $0x28] ss:$16 sps:$4 sm:$0xff]   ;;  %v2008_v40 = vld [vmem:[%s2434_s10 + $0x44] ss:$16 sps:$4 sm:$0xff]  }
  0x27   : > { %1898 = vmatpush3.bf16.msra.mxu0 %v1897_v12  ;;  %v2010_v41 = vld [vmem:[%s2434_s10 + $0x4c] ss:$16 sps:$4 sm:$0xff]   ;;  %v2012_v42 = vld [vmem:[%s2434_s10 + $0x40] ss:$16 sps:$4 sm:$0xff]   ;;  %v2013_v43 = vld [vmem:[%s2434_s10 + $0x48] ss:$16 sps:$4 sm:$0xff]  }
  0x28   : > { %1930 = vmatpush3.bf16.msra.mxu1 %v1929_v16  ;;  %1900 = vmatprep.subr.bf16.mxu0 %v1899_v17  ;;  %v2014_v44 = vld [vmem:[%s2434_s10 + $0x64] ss:$16 sps:$4 sm:$0xff]   ;;  %v2016_v45 = vld [vmem:[%s2434_s10 + $0x6c] ss:$16 sps:$4 sm:$0xff]   ;;  %v2018_v46 = vld [vmem:[%s2434_s10 + $0x60] ss:$16 sps:$4 sm:$0xff]  }
  0x29   : > { %1932 = vmatprep.subr.bf16.mxu1 %v1931_v19  ;;  %v2019_v47 = vld [vmem:[%s2434_s10 + $0x68] ss:$16 sps:$4 sm:$0xff]   ;;  %v2020_v48 = vld [vmem:[%s2434_s10 + $0x84] ss:$16 sps:$4 sm:$0xff]   ;;  %v2022_v49 = vld [vmem:[%s2434_s10 + $0x8c] ss:$16 sps:$4 sm:$0xff]  }
  0x2a   : > { %v2024_v50 = vld [vmem:[%s2434_s10 + $0x80] ss:$16 sps:$4 sm:$0xff]   ;;  %v2025_v51 = vld [vmem:[%s2434_s10 + $0x88] ss:$16 sps:$4 sm:$0xff]   ;;  %v2026_v52 = vld [vmem:[%s2434_s10 + $0xa4] ss:$16 sps:$4 sm:$0xff]  }
  0x2b   : > { %1902 = vmatpush3.bf16.msra.mxu0 %v1901_v24  ;;  %v2028_v53 = vld [vmem:[%s2434_s10 + $0xac] ss:$16 sps:$4 sm:$0xff]   ;;  %v2030_v54 = vld [vmem:[%s2434_s10 + $0xa0] ss:$16 sps:$4 sm:$0xff]   ;;  %v2031_v55 = vld [vmem:[%s2434_s10 + $0xa8] ss:$16 sps:$4 sm:$0xff]  }
  0x2c   : > { %1934 = vmatpush3.bf16.msra.mxu1 %v1933_v26  ;;  %1904 = vmatprep.subr.bf16.mxu0 %v1903_v27  ;;  %v2032_v56 = vld [vmem:[%s2434_s10 + $0xc4] ss:$16 sps:$4 sm:$0xff]   ;;  %v2034_v57 = vld [vmem:[%s2434_s10 + $0xcc] ss:$16 sps:$4 sm:$0xff]   ;;  %v2036_v58 = vld [vmem:[%s2434_s10 + $0xc0] ss:$16 sps:$4 sm:$0xff]  }
  0x2d   : > { %1936 = vmatprep.subr.bf16.mxu1 %v1935_v29  ;;  %v2037_v59 = vld [vmem:[%s2434_s10 + $0xc8] ss:$16 sps:$4 sm:$0xff]   ;;  %v2038_v60 = vld [vmem:[%s2434_s10 + $0xe4] ss:$16 sps:$4 sm:$0xff]   ;;  %v2040_v61 = vld [vmem:[%s2434_s10 + $0xec] ss:$16 sps:$4 sm:$0xff]  }
  0x2e   : > { %v2042_v62 = vld [vmem:[%s2434_s10 + $0xe0] ss:$16 sps:$4 sm:$0xff]   ;;  %v2043_v63 = vld [vmem:[%s2434_s10 + $0xe8] ss:$16 sps:$4 sm:$0xff]   ;;  %v2044_v0 = vld [vmem:[%s2434_s10 + $0x104] ss:$16 sps:$4 sm:$0xff]  }
  0x2f   : > { %1906 = vmatpush3.bf16.msra.mxu0 %v1905_v32  ;;  %v2046_v1 = vld [vmem:[%s2434_s10 + $0x10c] ss:$16 sps:$4 sm:$0xff]   ;;  %v2048_v2 = vld [vmem:[%s2434_s10 + $0x100] ss:$16 sps:$4 sm:$0xff]   ;;  %v2049_v3 = vld [vmem:[%s2434_s10 + $0x108] ss:$16 sps:$4 sm:$0xff]  }
  0x30   : > { %1938 = vmatpush3.bf16.msra.mxu1 %v1937_v33  ;;  %v2050_v4 = vld [vmem:[%s2434_s10 + $0x124] ss:$16 sps:$4 sm:$0xff]   ;;  %v2052_v5 = vld [vmem:[%s2434_s10 + $0x12c] ss:$16 sps:$4 sm:$0xff]   ;;  %v2054_v6 = vld [vmem:[%s2434_s10 + $0x120] ss:$16 sps:$4 sm:$0xff]  }
  0x31   : > { %v2055_v7 = vld [vmem:[%s2434_s10 + $0x128] ss:$16 sps:$4 sm:$0xff]   ;;  %v2056_v8 = vld [vmem:[%s2434_s10 + $0x144] ss:$16 sps:$4 sm:$0xff]   ;;  %v2058_v9 = vld [vmem:[%s2434_s10 + $0x14c] ss:$16 sps:$4 sm:$0xff]  }
  0x32   : > { %849 = vmatmul.mubr.bf16.vlgmr.msra.gmra.mrb[0].mxu0 %v1996_v34  ;;  %v2060_v10 = vld [vmem:[%s2434_s10 + $0x140] ss:$16 sps:$4 sm:$0xff]   ;;  %v2061_v11 = vld [vmem:[%s2434_s10 + $0x148] ss:$16 sps:$4 sm:$0xff]   ;;  %v2062_v12 = vld [vmem:[%s2434_s10 + $0x164] ss:$16 sps:$4 sm:$0xff]  }
  0x33   : > { %1042 = vmatmul.mubr.bf16.vlgmr.msra.gmra.mrb[0].mxu1 %v1999_v35  ;;  %856 = vmatprep.mubr.bf16.mxu0 %v2002_v36  ;;  %v2064_v13 = vld [vmem:[%s2434_s10 + $0x16c] ss:$16 sps:$4 sm:$0xff]   ;;  %v2066_v14 = vld [vmem:[%s2434_s10 + $0x160] ss:$16 sps:$4 sm:$0xff]   ;;  %v2067_v15 = vld [vmem:[%s2434_s10 + $0x168] ss:$16 sps:$4 sm:$0xff]  }
  0x34   : > { %1049 = vmatprep.mubr.bf16.mxu1 %v2004_v37  ;;  %v2068_v16 = vld [vmem:[%s2434_s10 + $0x184] ss:$16 sps:$4 sm:$0xff]   ;;  %v2070_v17 = vld [vmem:[%s2434_s10 + $0x18c] ss:$16 sps:$4 sm:$0xff]   ;;  %v2072_v18 = vld [vmem:[%s2434_s10 + $0x180] ss:$16 sps:$4 sm:$0xff]  }
  0x35   : > { %v2073_v19 = vld [vmem:[%s2434_s10 + $0x188] ss:$16 sps:$4 sm:$0xff]   ;;  %v2074_v20 = vld [vmem:[%s2434_s10 + $0x1a4] ss:$16 sps:$4 sm:$0xff]   ;;  %v2076_v21 = vld [vmem:[%s2434_s10 + $0x1ac] ss:$16 sps:$4 sm:$0xff]  }
  0x36   : > { %v2078_v22 = vld [vmem:[%s2434_s10 + $0x1a0] ss:$16 sps:$4 sm:$0xff]   ;;  %v2079_v23 = vld [vmem:[%s2434_s10 + $0x1a8] ss:$16 sps:$4 sm:$0xff]   ;;  %v2080_v24 = vld [vmem:[%s2434_s10 + $0x1c4] ss:$16 sps:$4 sm:$0xff]  }
  0x37   : > { %v2082_v25 = vld [vmem:[%s2434_s10 + $0x1cc] ss:$16 sps:$4 sm:$0xff]   ;;  %v2084_v26 = vld [vmem:[%s2434_s10 + $0x1c0] ss:$16 sps:$4 sm:$0xff]   ;;  %v2085_v27 = vld [vmem:[%s2434_s10 + $0x1c8] ss:$16 sps:$4 sm:$0xff]  }
  0x38   : > { %v2086_v28 = vld [vmem:[%s2434_s10 + $0x1e4] ss:$16 sps:$4 sm:$0xff]   ;;  %v2088_v29 = vld [vmem:[%s2434_s10 + $0x1ec] ss:$16 sps:$4 sm:$0xff]   ;;  %v2090_v30 = vld [vmem:[%s2434_s10 + $0x1e0] ss:$16 sps:$4 sm:$0xff]  }
  0x39   : > { %v2091_v31 = vld [vmem:[%s2434_s10 + $0x1e8] ss:$16 sps:$4 sm:$0xff]   ;;  %s2541_s10 = sshll.u32 %s231_s26, 8 }
  0x3a   : > { %857 = vmatmul.mubr.bf16.gmra.mrb[4].mxu0 %v2006_v38  ;;  %s2639_s12 = scalar_lea.vmem [#allocation3], %s2541_s10 }
  0x3b   : > { %1050 = vmatmul.mubr.bf16.gmra.mrb[4].mxu1 %v2007_v39  ;;  %864 = vmatprep.mubr.bf16.mxu0 %v2008_v40  ;;  %v1301_v39 = vld [vmem:[%s2537_s11] sm:$0xff]  ;;  %s1416_s13 = sshll.u32 %s2639_s12, 4  ;;  %s2734_s13 = int_to_ptr.vmem [resolvable:$true] %s1416_s13 }
  0x3c   : > { %1057 = vmatprep.mubr.bf16.mxu1 %v2010_v41  ;;  %s2092_s24 = scalar_lea.vmem %s2734_s13, 4096  ;;  %p2099_p1 = scmp.lt.s32.totalorder %s2734_s13, %s2097_s30 }
  0x3d   : > { %p2093_p12 = scmp.ne.s32.totalorder %s2734_s13, %s2092_s24  ;;  %p2100_p2 = scmp.lt.s32.totalorder %s2098_s5, %s2092_s24 }
  0x3f   : > { %p2094_p13 = pnand %p2093_p12, %p2240_p4  ;;  %p2101_p3 = por %p2100_p2, %p2099_p1 }
  0x41   : > { %p2095_p0 = pneg %p2094_p13 }
  0x42   : > { %865 = vmatmul.mubr.bf16.gmra.mrb[8].mxu0 %v2012_v42 }
  0x43   : > { %1058 = vmatmul.mubr.bf16.gmra.mrb[8].mxu1 %v2013_v43  ;;  %872 = vmatprep.mubr.bf16.mxu0 %v2014_v44  ;;  %v1302_v44 = vld [vmem:[%s2537_s11 + $0x8] sm:$0xff]  ;;  %p2102_p5 = pnand %p2101_p3, %p2095_p0 }
  0x44   : > { %1065 = vmatprep.mubr.bf16.mxu1 %v2016_v45  ;;  %v1303_v45 = vld [vmem:[%s2537_s11 + $0x10] sm:$0xff] }
  0x4a   : > { %873 = vmatmul.mubr.bf16.gmra.mrb[12].mxu0 %v2018_v46  ;;  %v1304_v46 = vld [vmem:[%s2537_s11 + $0x18] sm:$0xff] }
  0x4b   : > { %1066 = vmatmul.mubr.bf16.gmra.mrb[12].mxu1 %v2019_v47  ;;  %880 = vmatprep.mubr.bf16.mxu0 %v2020_v48  ;;  %v2548_v47 = vld [vmem:[%s2537_s11 + $0x20] sm:$0xff]  ;;  %v2551_v48 = vld [vmem:[%s2537_s11 + $0x28] sm:$0xff] }
  0x4c   : > { %1073 = vmatprep.mubr.bf16.mxu1 %v2022_v49  ;;  %v2554_v49 = vld [vmem:[%s2537_s11 + $0x30] sm:$0xff] }
  0x52   : > { %881 = vmatmul.mubr.bf16.gmra.mrb[16].mxu0 %v2024_v50  ;;  %v2557_v50 = vld [vmem:[%s2537_s11 + $0x38] sm:$0xff] }
  0x53   : > { %1074 = vmatmul.mubr.bf16.gmra.mrb[16].mxu1 %v2025_v51  ;;  %888 = vmatprep.mubr.bf16.mxu0 %v2026_v52  ;;  %v2560_v51 = vld [vmem:[%s2537_s11 + $0x40] sm:$0xff]  ;;  %v2563_v52 = vld [vmem:[%s2537_s11 + $0x48] sm:$0xff] }
  0x54   : > { %1081 = vmatprep.mubr.bf16.mxu1 %v2028_v53  ;;  %v2566_v53 = vld [vmem:[%s2537_s11 + $0x50] sm:$0xff] }
  0x5a   : > { %889 = vmatmul.mubr.bf16.gmra.mrb[20].mxu0 %v2030_v54  ;;  %v2569_v54 = vld [vmem:[%s2537_s11 + $0x58] sm:$0xff] }
  0x5b   : > { %1082 = vmatmul.mubr.bf16.gmra.mrb[20].mxu1 %v2031_v55  ;;  %896 = vmatprep.mubr.bf16.mxu0 %v2032_v56  ;;  %v2572_v55 = vld [vmem:[%s2537_s11 + $0x60] sm:$0xff]  ;;  %v2575_v56 = vld [vmem:[%s2537_s11 + $0x68] sm:$0xff] }
  0x5c   : > { %1089 = vmatprep.mubr.bf16.mxu1 %v2034_v57  ;;  %v2578_v57 = vld [vmem:[%s2537_s11 + $0x70] sm:$0xff] }
  0x62   : > { %897 = vmatmul.mubr.bf16.gmra.mrb[24].mxu0 %v2036_v58  ;;  %v2581_v58 = vld [vmem:[%s2537_s11 + $0x78] sm:$0xff] }
  0x63   : > { %1090 = vmatmul.mubr.bf16.gmra.mrb[24].mxu1 %v2037_v59  ;;  %904 = vmatprep.mubr.bf16.mxu0 %v2038_v60  ;;  %v2584_v59 = vld [vmem:[%s2537_s11 + $0x80] sm:$0xff]  ;;  %v2587_v60 = vld [vmem:[%s2537_s11 + $0x88] sm:$0xff] }
  0x64   : > { %1097 = vmatprep.mubr.bf16.mxu1 %v2040_v61  ;;  %v2590_v61 = vld [vmem:[%s2537_s11 + $0x90] sm:$0xff] }
  0x6a   : > { %905 = vmatmul.mubr.bf16.gmra.mrb[28].mxu0 %v2042_v62  ;;  %v2593_v62 = vld [vmem:[%s2537_s11 + $0x98] sm:$0xff] }
  0x6b   : > { %1098 = vmatmul.mubr.bf16.gmra.mrb[28].mxu1 %v2043_v63  ;;  %912 = vmatprep.mubr.bf16.mxu0 %v2044_v0  ;;  %v2596_v63 = vld [vmem:[%s2537_s11 + $0xa0] sm:$0xff]  ;;  %v2599_v0 = vld [vmem:[%s2537_s11 + $0xa8] sm:$0xff] }
  0x6c   : > { %1105 = vmatprep.mubr.bf16.mxu1 %v2046_v1  ;;  %v2602_v1 = vld [vmem:[%s2537_s11 + $0xb0] sm:$0xff] }
  0x72   : > { %913 = vmatmul.mubr.bf16.gmra.mrb[32].mxu0 %v2048_v2  ;;  %v2605_v2 = vld [vmem:[%s2537_s11 + $0xb8] sm:$0xff] }
  0x73   : > { %1106 = vmatmul.mubr.bf16.gmra.mrb[32].mxu1 %v2049_v3  ;;  %920 = vmatprep.mubr.bf16.mxu0 %v2050_v4  ;;  %v2608_v3 = vld [vmem:[%s2537_s11 + $0xc0] sm:$0xff]  ;;  %v2611_v4 = vld [vmem:[%s2537_s11 + $0xc8] sm:$0xff] }
  0x74   : > { %1113 = vmatprep.mubr.bf16.mxu1 %v2052_v5 }
  0x7a   : > { %921 = vmatmul.mubr.bf16.gmra.mrb[36].mxu0 %v2054_v6 }
  0x7b   : > { %1114 = vmatmul.mubr.bf16.gmra.mrb[36].mxu1 %v2055_v7  ;;  %928 = vmatprep.mubr.bf16.mxu0 %v2056_v8  ;;  %v2614_v7 = vld [vmem:[%s2537_s11 + $0xd0] sm:$0xff]  ;;  %v2617_v8 = vld [vmem:[%s2537_s11 + $0xd8] sm:$0xff] }
  0x7c   : > { %1121 = vmatprep.mubr.bf16.mxu1 %v2058_v9  ;;  %v2620_v9 = vld [vmem:[%s2537_s11 + $0xe0] sm:$0xff] }
  0x82   : > { %929 = vmatmul.mubr.bf16.gmra.mrb[40].mxu0 %v2060_v10  ;;  %v2630_v10 = vld [vmem:[%s2537_s11 + $0xe8] sm:$0xff] }
  0x83   : > { %1122 = vmatmul.mubr.bf16.gmra.mrb[40].mxu1 %v2061_v11  ;;  %936 = vmatprep.mubr.bf16.mxu0 %v2062_v12  ;;  %v2633_v11 = vld [vmem:[%s2537_s11 + $0xf0] sm:$0xff]  ;;  %v2636_v12 = vld [vmem:[%s2537_s11 + $0xf8] sm:$0xff] }
  0x84   : > { %1129 = vmatprep.mubr.bf16.mxu1 %v2064_v13 }
  0x8a   : > { %937 = vmatmul.mubr.bf16.gmra.mrb[44].mxu0 %v2066_v14 }
  0x8b   : > { %1130 = vmatmul.mubr.bf16.gmra.mrb[44].mxu1 %v2067_v15  ;;  %944 = vmatprep.mubr.bf16.mxu0 %v2068_v16 }
  0x8c   : > { %1137 = vmatprep.mubr.bf16.mxu1 %v2070_v17 }
  0x92   : > { %945 = vmatmul.mubr.bf16.gmra.mrb[48].mxu0 %v2072_v18 }
  0x93   : > { %1138 = vmatmul.mubr.bf16.gmra.mrb[48].mxu1 %v2073_v19  ;;  %952 = vmatprep.mubr.bf16.mxu0 %v2074_v20 }
  0x94   : > { %1145 = vmatprep.mubr.bf16.mxu1 %v2076_v21 }
  0x9a   : > { %953 = vmatmul.mubr.bf16.gmra.mrb[52].mxu0 %v2078_v22 }
  0x9b   : > { %1146 = vmatmul.mubr.bf16.gmra.mrb[52].mxu1 %v2079_v23  ;;  %960 = vmatprep.mubr.bf16.mxu0 %v2080_v24 }
  0x9c   : > { %1153 = vmatprep.mubr.bf16.mxu1 %v2082_v25 }
  0xa2   : > { %961 = vmatmul.mubr.bf16.gmra.mrb[56].mxu0 %v2084_v26 }
  0xa3   : > { %1154 = vmatmul.mubr.bf16.gmra.mrb[56].mxu1 %v2085_v27  ;;  %968 = vmatprep.mubr.bf16.mxu0 %v2086_v28 }
  0xa4   : > { %1161 = vmatprep.mubr.bf16.mxu1 %v2088_v29 }
  0xaa   : > { %969 = vmatmul.mubr.bf16.gmra.mrb[60].mxu0 %v2090_v30 }
  0xab   : > { %1162 = vmatmul.mubr.bf16.gmra.mrb[60].mxu1 %v2091_v31 }
 0x105   : > { %v1651_v32 = vpop.f32.mrb[0].mxu0 }
 0x106   : > { %v1779_v33 = vpop.f32.mrb[0].mxu1  ;;  %v1652_v34 = vpop.f32.mrb[1].mxu0 }
 0x107   : > { %v1653_v35 = vadd.f32 %v1652_v34, %v1651_v32  ;;  %v1780_v36 = vpop.f32.mrb[1].mxu1  ;;  %v1654_v37 = vpop.f32.mrb[2].mxu0 }
 0x108   : > { %v1781_v38 = vadd.f32 %v1780_v36, %v1779_v33  ;;  %v1782_v40 = vpop.f32.mrb[2].mxu1  ;;  %v1655_v41 = vpop.f32.mrb[3].mxu0 }
 0x109   : > { %v1656_v42 = vadd.f32 %v1655_v41, %v1654_v37  ;;  %v1783_v43 = vpop.f32.mrb[3].mxu1 }
 0x10a   : > { %v1044_v5 = vadd.f32 %v1781_v38, %v1653_v35  ;;  %v1784_v6 = vadd.f32 %v1783_v43, %v1782_v40 }
 0x10c   : > { %1269 = vst [vmem:[%s2639_s12] sm:$0xff] %v1044_v5  ;;  %v1333_v13 = vadd.f32 %v1301_v39, %v1044_v5  ;;  %v1047_v14 = vadd.f32 %v1784_v6, %v1656_v42 }
 0x10d   : > { %v1657_v15 = vpop.f32.mrb[4].mxu0 }
 0x10e   : > { %1270 = vst [vmem:[%s2639_s12 + $0x8] sm:$0xff] %v1047_v14  ;;  %v1334_v16 = vadd.f32 %v1302_v44, %v1047_v14  ;;  %v1785_v17 = vpop.f32.mrb[4].mxu1  ;;  %v1658_v18 = vpop.f32.mrb[5].mxu0  ;;  %1365 = vst [vmem:[%s2627_s9] sm:$0xff] %v1333_v13 }
 0x10f   : > { %v1659_v19 = vadd.f32 %v1658_v18, %v1657_v15  ;;  %v1786_v20 = vpop.f32.mrb[5].mxu1  ;;  %v1660_v21 = vpop.f32.mrb[6].mxu0 }
 0x110   : > { %v1787_v22 = vadd.f32 %v1786_v20, %v1785_v17  ;;  %v1788_v23 = vpop.f32.mrb[6].mxu1  ;;  %v1661_v24 = vpop.f32.mrb[7].mxu0  ;;  %1366 = vst [vmem:[%s2627_s9 + $0x8] sm:$0xff] %v1334_v16 }
 0x111   : > { %v1662_v25 = vadd.f32 %v1661_v24, %v1660_v21  ;;  %v1789_v26 = vpop.f32.mrb[7].mxu1 }
 0x112   : > { %v1052_v27 = vadd.f32 %v1787_v22, %v1659_v19  ;;  %v1790_v28 = vadd.f32 %v1789_v26, %v1788_v23 }
 0x114   : > { %1271 = vst [vmem:[%s2639_s12 + $0x10] sm:$0xff] %v1052_v27  ;;  %v1335_v29 = vadd.f32 %v1303_v45, %v1052_v27  ;;  %v1055_v30 = vadd.f32 %v1790_v28, %v1662_v25 }
 0x115   : > { %v1663_v31 = vpop.f32.mrb[8].mxu0 }
 0x116   : > { %1272 = vst [vmem:[%s2639_s12 + $0x18] sm:$0xff] %v1055_v30  ;;  %v1336_v32 = vadd.f32 %v1304_v46, %v1055_v30  ;;  %v1791_v33 = vpop.f32.mrb[8].mxu1  ;;  %v1664_v34 = vpop.f32.mrb[9].mxu0  ;;  %1367 = vst [vmem:[%s2627_s9 + $0x10] sm:$0xff] %v1335_v29 }
 0x117   : > { %v1665_v35 = vadd.f32 %v1664_v34, %v1663_v31  ;;  %v1792_v36 = vpop.f32.mrb[9].mxu1  ;;  %v1666_v37 = vpop.f32.mrb[10].mxu0 }
 0x118   : > { %v1793_v38 = vadd.f32 %v1792_v36, %v1791_v33  ;;  %v1794_v39 = vpop.f32.mrb[10].mxu1  ;;  %v1667_v40 = vpop.f32.mrb[11].mxu0  ;;  %1368 = vst [vmem:[%s2627_s9 + $0x18] sm:$0xff] %v1336_v32 }
 0x119   : > { %v1668_v41 = vadd.f32 %v1667_v40, %v1666_v37  ;;  %v1795_v42 = vpop.f32.mrb[11].mxu1 }
 0x11a   : > { %v1060_v43 = vadd.f32 %v1793_v38, %v1665_v35  ;;  %v1796_v44 = vadd.f32 %v1795_v42, %v1794_v39 }
 0x11c   : > { %1273 = vst [vmem:[%s2639_s12 + $0x20] sm:$0xff] %v1060_v43  ;;  %v1337_v45 = vadd.f32 %v2548_v47, %v1060_v43  ;;  %v1063_v46 = vadd.f32 %v1796_v44, %v1668_v41 }
 0x11d   : > { %v1669_v5 = vpop.f32.mrb[12].mxu0 }
 0x11e   : > { %1274 = vst [vmem:[%s2639_s12 + $0x28] sm:$0xff] %v1063_v46  ;;  %v1338_v6 = vadd.f32 %v2551_v48, %v1063_v46  ;;  %v1797_v13 = vpop.f32.mrb[12].mxu1  ;;  %v1670_v14 = vpop.f32.mrb[13].mxu0  ;;  %1369 = vst [vmem:[%s2627_s9 + $0x20] sm:$0xff] %v1337_v45 }
 0x11f   : > { %v1671_v15 = vadd.f32 %v1670_v14, %v1669_v5  ;;  %v1798_v16 = vpop.f32.mrb[13].mxu1  ;;  %v1672_v17 = vpop.f32.mrb[14].mxu0 }
 0x120   : > { %v1799_v18 = vadd.f32 %v1798_v16, %v1797_v13  ;;  %v1800_v19 = vpop.f32.mrb[14].mxu1  ;;  %v1673_v20 = vpop.f32.mrb[15].mxu0  ;;  %1370 = vst [vmem:[%s2627_s9 + $0x28] sm:$0xff] %v1338_v6 }
 0x121   : > { %v1674_v21 = vadd.f32 %v1673_v20, %v1672_v17  ;;  %v1801_v47 = vpop.f32.mrb[15].mxu1 }
 0x122   : > { %v1068_v22 = vadd.f32 %v1799_v18, %v1671_v15  ;;  %v1802_v23 = vadd.f32 %v1801_v47, %v1800_v19 }
 0x124   : > { %1275 = vst [vmem:[%s2639_s12 + $0x30] sm:$0xff] %v1068_v22  ;;  %v1339_v48 = vadd.f32 %v2554_v49, %v1068_v22  ;;  %v1071_v24 = vadd.f32 %v1802_v23, %v1674_v21 }
 0x125   : > { %v1675_v25 = vpop.f32.mrb[16].mxu0 }
 0x126   : > { %1276 = vst [vmem:[%s2639_s12 + $0x38] sm:$0xff] %v1071_v24  ;;  %v1340_v26 = vadd.f32 %v2557_v50, %v1071_v24  ;;  %v1803_v27 = vpop.f32.mrb[16].mxu1  ;;  %v1676_v28 = vpop.f32.mrb[17].mxu0  ;;  %1371 = vst [vmem:[%s2627_s9 + $0x30] sm:$0xff] %v1339_v48 }
 0x127   : > { %v1677_v29 = vadd.f32 %v1676_v28, %v1675_v25  ;;  %v1804_v30 = vpop.f32.mrb[17].mxu1  ;;  %v1678_v31 = vpop.f32.mrb[18].mxu0 }
 0x128   : > { %v1805_v32 = vadd.f32 %v1804_v30, %v1803_v27  ;;  %v1806_v33 = vpop.f32.mrb[18].mxu1  ;;  %v1679_v34 = vpop.f32.mrb[19].mxu0  ;;  %1372 = vst [vmem:[%s2627_s9 + $0x38] sm:$0xff] %v1340_v26 }
 0x129   : > { %v1680_v35 = vadd.f32 %v1679_v34, %v1678_v31  ;;  %v1807_v49 = vpop.f32.mrb[19].mxu1 }
 0x12a   : > { %v1076_v36 = vadd.f32 %v1805_v32, %v1677_v29  ;;  %v1808_v37 = vadd.f32 %v1807_v49, %v1806_v33 }
 0x12c   : > { %1277 = vst [vmem:[%s2639_s12 + $0x40] sm:$0xff] %v1076_v36  ;;  %v1341_v50 = vadd.f32 %v2560_v51, %v1076_v36  ;;  %v1079_v38 = vadd.f32 %v1808_v37, %v1680_v35 }
 0x12d   : > { %v1681_v39 = vpop.f32.mrb[20].mxu0 }
 0x12e   : > { %1278 = vst [vmem:[%s2639_s12 + $0x48] sm:$0xff] %v1079_v38  ;;  %v1342_v40 = vadd.f32 %v2563_v52, %v1079_v38  ;;  %v1809_v41 = vpop.f32.mrb[20].mxu1  ;;  %v1682_v42 = vpop.f32.mrb[21].mxu0  ;;  %1373 = vst [vmem:[%s2627_s9 + $0x40] sm:$0xff] %v1341_v50 }
 0x12f   : > { %v1683_v43 = vadd.f32 %v1682_v42, %v1681_v39  ;;  %v1810_v44 = vpop.f32.mrb[21].mxu1  ;;  %v1684_v45 = vpop.f32.mrb[22].mxu0 }
 0x130   : > { %v1811_v46 = vadd.f32 %v1810_v44, %v1809_v41  ;;  %v1812_v5 = vpop.f32.mrb[22].mxu1  ;;  %v1685_v6 = vpop.f32.mrb[23].mxu0  ;;  %1374 = vst [vmem:[%s2627_s9 + $0x48] sm:$0xff] %v1342_v40 }
 0x131   : > { %v1686_v13 = vadd.f32 %v1685_v6, %v1684_v45  ;;  %v1813_v51 = vpop.f32.mrb[23].mxu1 }
 0x132   : > { %v1084_v14 = vadd.f32 %v1811_v46, %v1683_v43  ;;  %v1814_v15 = vadd.f32 %v1813_v51, %v1812_v5 }
 0x134   : > { %1279 = vst [vmem:[%s2639_s12 + $0x50] sm:$0xff] %v1084_v14  ;;  %v1343_v52 = vadd.f32 %v2566_v53, %v1084_v14  ;;  %v1087_v16 = vadd.f32 %v1814_v15, %v1686_v13 }
 0x135   : > { %v1687_v17 = vpop.f32.mrb[24].mxu0 }
 0x136   : > { %1280 = vst [vmem:[%s2639_s12 + $0x58] sm:$0xff] %v1087_v16  ;;  %v1344_v18 = vadd.f32 %v2569_v54, %v1087_v16  ;;  %v1815_v19 = vpop.f32.mrb[24].mxu1  ;;  %v1688_v20 = vpop.f32.mrb[25].mxu0  ;;  %1375 = vst [vmem:[%s2627_s9 + $0x50] sm:$0xff] %v1343_v52 }
 0x137   : > { %v1689_v21 = vadd.f32 %v1688_v20, %v1687_v17  ;;  %v1816_v47 = vpop.f32.mrb[25].mxu1  ;;  %v1690_v22 = vpop.f32.mrb[26].mxu0 }
 0x138   : > { %v1817_v23 = vadd.f32 %v1816_v47, %v1815_v19  ;;  %v1818_v48 = vpop.f32.mrb[26].mxu1  ;;  %v1691_v24 = vpop.f32.mrb[27].mxu0  ;;  %1376 = vst [vmem:[%s2627_s9 + $0x58] sm:$0xff] %v1344_v18 }
 0x139   : > { %v1692_v25 = vadd.f32 %v1691_v24, %v1690_v22  ;;  %v1819_v53 = vpop.f32.mrb[27].mxu1 }
 0x13a   : > { %v1092_v26 = vadd.f32 %v1817_v23, %v1689_v21  ;;  %v1820_v27 = vadd.f32 %v1819_v53, %v1818_v48 }
 0x13c   : > { %1281 = vst [vmem:[%s2639_s12 + $0x60] sm:$0xff] %v1092_v26  ;;  %v1345_v54 = vadd.f32 %v2572_v55, %v1092_v26  ;;  %v1095_v28 = vadd.f32 %v1820_v27, %v1692_v25 }
 0x13d   : > { %v1693_v29 = vpop.f32.mrb[28].mxu0 }
 0x13e   : > { %1282 = vst [vmem:[%s2639_s12 + $0x68] sm:$0xff] %v1095_v28  ;;  %v1346_v30 = vadd.f32 %v2575_v56, %v1095_v28  ;;  %v1821_v31 = vpop.f32.mrb[28].mxu1  ;;  %v1694_v32 = vpop.f32.mrb[29].mxu0  ;;  %1377 = vst [vmem:[%s2627_s9 + $0x60] sm:$0xff] %v1345_v54 }
 0x13f   : > { %v1695_v33 = vadd.f32 %v1694_v32, %v1693_v29  ;;  %v1822_v34 = vpop.f32.mrb[29].mxu1  ;;  %v1696_v35 = vpop.f32.mrb[30].mxu0 }
 0x140   : > { %v1823_v49 = vadd.f32 %v1822_v34, %v1821_v31  ;;  %v1824_v36 = vpop.f32.mrb[30].mxu1  ;;  %v1697_v37 = vpop.f32.mrb[31].mxu0  ;;  %1378 = vst [vmem:[%s2627_s9 + $0x68] sm:$0xff] %v1346_v30 }
 0x141   : > { %v1698_v50 = vadd.f32 %v1697_v37, %v1696_v35  ;;  %v1825_v55 = vpop.f32.mrb[31].mxu1 }
 0x142   : > { %v1100_v38 = vadd.f32 %v1823_v49, %v1695_v33  ;;  %v1826_v39 = vadd.f32 %v1825_v55, %v1824_v36 }
 0x144   : > { %1283 = vst [vmem:[%s2639_s12 + $0x70] sm:$0xff] %v1100_v38  ;;  %v1347_v56 = vadd.f32 %v2578_v57, %v1100_v38  ;;  %v1103_v40 = vadd.f32 %v1826_v39, %v1698_v50 }
 0x145   : > { %v1699_v41 = vpop.f32.mrb[32].mxu0 }
 0x146   : > { %1284 = vst [vmem:[%s2639_s12 + $0x78] sm:$0xff] %v1103_v40  ;;  %v1348_v42 = vadd.f32 %v2581_v58, %v1103_v40  ;;  %v1827_v43 = vpop.f32.mrb[32].mxu1  ;;  %v1700_v44 = vpop.f32.mrb[33].mxu0  ;;  %1379 = vst [vmem:[%s2627_s9 + $0x70] sm:$0xff] %v1347_v56 }
 0x147   : > { %v1701_v45 = vadd.f32 %v1700_v44, %v1699_v41  ;;  %v1828_v46 = vpop.f32.mrb[33].mxu1  ;;  %v1702_v5 = vpop.f32.mrb[34].mxu0 }
 0x148   : > { %v1829_v6 = vadd.f32 %v1828_v46, %v1827_v43  ;;  %v1830_v13 = vpop.f32.mrb[34].mxu1  ;;  %v1703_v51 = vpop.f32.mrb[35].mxu0  ;;  %1380 = vst [vmem:[%s2627_s9 + $0x78] sm:$0xff] %v1348_v42 }
 0x149   : > { %v1704_v14 = vadd.f32 %v1703_v51, %v1702_v5  ;;  %v1831_v57 = vpop.f32.mrb[35].mxu1 }
 0x14a   : > { %v1108_v15 = vadd.f32 %v1829_v6, %v1701_v45  ;;  %v1832_v52 = vadd.f32 %v1831_v57, %v1830_v13 }
 0x14c   : > { %1285 = vst [vmem:[%s2639_s12 + $0x80] sm:$0xff] %v1108_v15  ;;  %v1349_v58 = vadd.f32 %v2584_v59, %v1108_v15  ;;  %v1111_v16 = vadd.f32 %v1832_v52, %v1704_v14 }
 0x14d   : > { %v1705_v17 = vpop.f32.mrb[36].mxu0 }
 0x14e   : > { %1286 = vst [vmem:[%s2639_s12 + $0x88] sm:$0xff] %v1111_v16  ;;  %v1350_v18 = vadd.f32 %v2587_v60, %v1111_v16  ;;  %v1833_v19 = vpop.f32.mrb[36].mxu1  ;;  %v1706_v20 = vpop.f32.mrb[37].mxu0  ;;  %1381 = vst [vmem:[%s2627_s9 + $0x80] sm:$0xff] %v1349_v58 }
 0x14f   : > { %v1707_v21 = vadd.f32 %v1706_v20, %v1705_v17  ;;  %v1834_v47 = vpop.f32.mrb[37].mxu1  ;;  %v1708_v22 = vpop.f32.mrb[38].mxu0 }
 0x150   : > { %v1835_v23 = vadd.f32 %v1834_v47, %v1833_v19  ;;  %v1836_v48 = vpop.f32.mrb[38].mxu1  ;;  %v1709_v24 = vpop.f32.mrb[39].mxu0  ;;  %1382 = vst [vmem:[%s2627_s9 + $0x88] sm:$0xff] %v1350_v18 }
 0x151   : > { %v1710_v25 = vadd.f32 %v1709_v24, %v1708_v22  ;;  %v1837_v59 = vpop.f32.mrb[39].mxu1 }
 0x152   : > { %v1116_v53 = vadd.f32 %v1835_v23, %v1707_v21  ;;  %v1838_v26 = vadd.f32 %v1837_v59, %v1836_v48 }
 0x154   : > { %1287 = vst [vmem:[%s2639_s12 + $0x90] sm:$0xff] %v1116_v53  ;;  %v1351_v60 = vadd.f32 %v2590_v61, %v1116_v53  ;;  %v1119_v27 = vadd.f32 %v1838_v26, %v1710_v25 }
 0x155   : > { %v1711_v54 = vpop.f32.mrb[40].mxu0 }
 0x156   : > { %1288 = vst [vmem:[%s2639_s12 + $0x98] sm:$0xff] %v1119_v27  ;;  %v1352_v28 = vadd.f32 %v2593_v62, %v1119_v27  ;;  %v1839_v29 = vpop.f32.mrb[40].mxu1  ;;  %v1712_v30 = vpop.f32.mrb[41].mxu0  ;;  %1383 = vst [vmem:[%s2627_s9 + $0x90] sm:$0xff] %v1351_v60 }
 0x157   : > { %v1713_v31 = vadd.f32 %v1712_v30, %v1711_v54  ;;  %v1840_v32 = vpop.f32.mrb[41].mxu1  ;;  %v1714_v33 = vpop.f32.mrb[42].mxu0 }
 0x158   : > { %v1841_v34 = vadd.f32 %v1840_v32, %v1839_v29  ;;  %v1842_v35 = vpop.f32.mrb[42].mxu1  ;;  %v1715_v49 = vpop.f32.mrb[43].mxu0  ;;  %1384 = vst [vmem:[%s2627_s9 + $0x98] sm:$0xff] %v1352_v28 }
 0x159   : > { %v1716_v36 = vadd.f32 %v1715_v49, %v1714_v33  ;;  %v1843_v61 = vpop.f32.mrb[43].mxu1 }
 0x15a   : > { %v1124_v37 = vadd.f32 %v1841_v34, %v1713_v31  ;;  %v1844_v50 = vadd.f32 %v1843_v61, %v1842_v35 }
 0x15c   : > { %1289 = vst [vmem:[%s2639_s12 + $0xa0] sm:$0xff] %v1124_v37  ;;  %v1353_v62 = vadd.f32 %v2596_v63, %v1124_v37  ;;  %v1127_v55 = vadd.f32 %v1844_v50, %v1716_v36 }
 0x15d   : > { %v1717_v38 = vpop.f32.mrb[44].mxu0 }
 0x15e   : > { %1290 = vst [vmem:[%s2639_s12 + $0xa8] sm:$0xff] %v1127_v55  ;;  %v1354_v39 = vadd.f32 %v2599_v0, %v1127_v55  ;;  %v1845_v56 = vpop.f32.mrb[44].mxu1  ;;  %v1718_v40 = vpop.f32.mrb[45].mxu0  ;;  %1385 = vst [vmem:[%s2627_s9 + $0xa0] sm:$0xff] %v1353_v62 }
 0x15f   : > { %v1719_v41 = vadd.f32 %v1718_v40, %v1717_v38  ;;  %v1846_v42 = vpop.f32.mrb[45].mxu1  ;;  %v1720_v43 = vpop.f32.mrb[46].mxu0 }
 0x160   : > { %v1847_v44 = vadd.f32 %v1846_v42, %v1845_v56  ;;  %v1848_v45 = vpop.f32.mrb[46].mxu1  ;;  %v1721_v46 = vpop.f32.mrb[47].mxu0  ;;  %1386 = vst [vmem:[%s2627_s9 + $0xa8] sm:$0xff] %v1354_v39 }
 0x161   : > { %v1722_v5 = vadd.f32 %v1721_v46, %v1720_v43  ;;  %v1849_v63 = vpop.f32.mrb[47].mxu1 }
 0x162   : > { %v1132_v6 = vadd.f32 %v1847_v44, %v1719_v41  ;;  %v1850_v13 = vadd.f32 %v1849_v63, %v1848_v45 }
 0x164   : > { %1291 = vst [vmem:[%s2639_s12 + $0xb0] sm:$0xff] %v1132_v6  ;;  %v1355_v0 = vadd.f32 %v2602_v1, %v1132_v6  ;;  %v1135_v51 = vadd.f32 %v1850_v13, %v1722_v5 }
 0x165   : > { %v1723_v14 = vpop.f32.mrb[48].mxu0 }
 0x166   : > { %1292 = vst [vmem:[%s2639_s12 + $0xb8] sm:$0xff] %v1135_v51  ;;  %v1356_v57 = vadd.f32 %v2605_v2, %v1135_v51  ;;  %v1851_v15 = vpop.f32.mrb[48].mxu1  ;;  %v1724_v52 = vpop.f32.mrb[49].mxu0  ;;  %1387 = vst [vmem:[%s2627_s9 + $0xb0] sm:$0xff] %v1355_v0 }
 0x167   : > { %v1725_v58 = vadd.f32 %v1724_v52, %v1723_v14  ;;  %v1852_v16 = vpop.f32.mrb[49].mxu1  ;;  %v1726_v17 = vpop.f32.mrb[50].mxu0 }
 0x168   : > { %v1853_v18 = vadd.f32 %v1852_v16, %v1851_v15  ;;  %v1854_v19 = vpop.f32.mrb[50].mxu1  ;;  %v1727_v20 = vpop.f32.mrb[51].mxu0  ;;  %1388 = vst [vmem:[%s2627_s9 + $0xb8] sm:$0xff] %v1356_v57 }
 0x169   : > { %v1728_v21 = vadd.f32 %v1727_v20, %v1726_v17  ;;  %v1855_v1 = vpop.f32.mrb[51].mxu1 }
 0x16a   : > { %v1140_v47 = vadd.f32 %v1853_v18, %v1725_v58  ;;  %v1856_v22 = vadd.f32 %v1855_v1, %v1854_v19 }
 0x16c   : > { %1293 = vst [vmem:[%s2639_s12 + $0xc0] sm:$0xff] %v1140_v47  ;;  %v1357_v2 = vadd.f32 %v2608_v3, %v1140_v47  ;;  %v1143_v23 = vadd.f32 %v1856_v22, %v1728_v21 }
 0x16d   : > { %v1729_v48 = vpop.f32.mrb[52].mxu0 }
 0x16e   : > { %1294 = vst [vmem:[%s2639_s12 + $0xc8] sm:$0xff] %v1143_v23  ;;  %v1358_v24 = vadd.f32 %v2611_v4, %v1143_v23  ;;  %v1857_v25 = vpop.f32.mrb[52].mxu1  ;;  %v1730_v59 = vpop.f32.mrb[53].mxu0  ;;  %1389 = vst [vmem:[%s2627_s9 + $0xc0] sm:$0xff] %v1357_v2 }
 0x16f   : > { %v1731_v53 = vadd.f32 %v1730_v59, %v1729_v48  ;;  %v1858_v26 = vpop.f32.mrb[53].mxu1  ;;  %v1732_v60 = vpop.f32.mrb[54].mxu0 }
 0x170   : > { %v1859_v27 = vadd.f32 %v1858_v26, %v1857_v25  ;;  %v1860_v54 = vpop.f32.mrb[54].mxu1  ;;  %v1733_v28 = vpop.f32.mrb[55].mxu0  ;;  %1390 = vst [vmem:[%s2627_s9 + $0xc8] sm:$0xff] %v1358_v24 }
 0x171   : > { %v1734_v29 = vadd.f32 %v1733_v28, %v1732_v60  ;;  %v1861_v3 = vpop.f32.mrb[55].mxu1 }
 0x172   : > { %v1148_v30 = vadd.f32 %v1859_v27, %v1731_v53  ;;  %v1862_v31 = vadd.f32 %v1861_v3, %v1860_v54 }
 0x174   : > { %1295 = vst [vmem:[%s2639_s12 + $0xd0] sm:$0xff] %v1148_v30  ;;  %v1359_v4 = vadd.f32 %v2614_v7, %v1148_v30  ;;  %v1151_v32 = vadd.f32 %v1862_v31, %v1734_v29 }
 0x175   : > { %v1735_v33 = vpop.f32.mrb[56].mxu0 }
 0x176   : > { %1296 = vst [vmem:[%s2639_s12 + $0xd8] sm:$0xff] %v1151_v32  ;;  %v1360_v34 = vadd.f32 %v2617_v8, %v1151_v32  ;;  %v1863_v35 = vpop.f32.mrb[56].mxu1  ;;  %v1736_v49 = vpop.f32.mrb[57].mxu0  ;;  %1391 = vst [vmem:[%s2627_s9 + $0xd0] sm:$0xff] %v1359_v4 }
 0x177   : > { %v1737_v36 = vadd.f32 %v1736_v49, %v1735_v33  ;;  %v1864_v61 = vpop.f32.mrb[57].mxu1  ;;  %v1738_v37 = vpop.f32.mrb[58].mxu0 }
 0x178   : > { %v1865_v50 = vadd.f32 %v1864_v61, %v1863_v35  ;;  %v1866_v62 = vpop.f32.mrb[58].mxu1  ;;  %v1739_v55 = vpop.f32.mrb[59].mxu0  ;;  %1392 = vst [vmem:[%s2627_s9 + $0xd8] sm:$0xff] %v1360_v34 }
 0x179   : > { %v1740_v38 = vadd.f32 %v1739_v55, %v1738_v37  ;;  %v1867_v7 = vpop.f32.mrb[59].mxu1 }
 0x17a   : > { %v1156_v39 = vadd.f32 %v1865_v50, %v1737_v36  ;;  %v1868_v56 = vadd.f32 %v1867_v7, %v1866_v62 }
 0x17c   : > { %1297 = vst [vmem:[%s2639_s12 + $0xe0] sm:$0xff] %v1156_v39  ;;  %v1361_v8 = vadd.f32 %v2620_v9, %v1156_v39  ;;  %v1159_v40 = vadd.f32 %v1868_v56, %v1740_v38 }
 0x17d   : > { %v1741_v41 = vpop.f32.mrb[60].mxu0 }
 0x17e   : > { %1298 = vst [vmem:[%s2639_s12 + $0xe8] sm:$0xff] %v1159_v40  ;;  %v1362_v42 = vadd.f32 %v2630_v10, %v1159_v40  ;;  %v1869_v43 = vpop.f32.mrb[60].mxu1  ;;  %v1742_v44 = vpop.f32.mrb[61].mxu0  ;;  %1393 = vst [vmem:[%s2627_s9 + $0xe0] sm:$0xff] %v1361_v8 }
 0x17f   : > { %v1743_v45 = vadd.f32 %v1742_v44, %v1741_v41  ;;  %v1870_v46 = vpop.f32.mrb[61].mxu1  ;;  %v1744_v5 = vpop.f32.mrb[62].mxu0 }
 0x180   : > { %v1871_v63 = vadd.f32 %v1870_v46, %v1869_v43  ;;  %v1872_v6 = vpop.f32.mrb[62].mxu1  ;;  %v1745_v13 = vpop.f32.mrb[63].mxu0  ;;  %1394 = vst [vmem:[%s2627_s9 + $0xe8] sm:$0xff] %v1362_v42 }
 0x181   : > { %v1746_v9 = vadd.f32 %v1745_v13, %v1744_v5  ;;  %v1873_v0 = vpop.f32.mrb[63].mxu1 }
 0x182   : > { %v1164_v10 = vadd.f32 %v1871_v63, %v1743_v45  ;;  %v1874_v51 = vadd.f32 %v1873_v0, %v1872_v6 }
 0x184   : > { %1299 = vst [vmem:[%s2639_s12 + $0xf0] sm:$0xff] %v1164_v10  ;;  %v1363_v14 = vadd.f32 %v2633_v11, %v1164_v10  ;;  %v1167_v57 = vadd.f32 %v1874_v51, %v1746_v9 }
 0x186   : > { %1300 = vst [vmem:[%s2639_s12 + $0xf8] sm:$0xff] %v1167_v57  ;;  %v1364_v15 = vadd.f32 %v2636_v12, %v1167_v57  ;;  %1395 = vst [vmem:[%s2627_s9 + $0xf0] sm:$0xff] %v1363_v14 }
 0x187   : > { %2105 = shalt.err (!%p2102_p5)
}
 0x188   : > { %s2106_s26 = scalar_lea.hbm %s2732_s22, 4096  ;;  %s2110_s6 = scalar_lea.hbm %s2793_s3, 8192 }
 0x189   : > { %p2107_p6 = scmp.ne.s32.totalorder %s2732_s22, %s2106_s26  ;;  %p2111_p10 = scmp.lt.u32.totalorder %s2732_s22, %s2793_s3 }
 0x18a   : > { %p2112_p11 = scmp.lt.u32.totalorder %s2110_s6, %s2106_s26  ;;  %p2114_p13 = scmp.lt.u32.totalorder %s2106_s26, %s2732_s22 }
 0x18b   : > { %p2108_p7 = pnand %p2107_p6, %p2240_p4 }
 0x18c   : > { %p2113_p12 = por %p2112_p11, %p2111_p10 }
 0x18d   : > { %p2109_p9 = pneg %p2108_p7 }
 0x18e   : > { %p2115_p0 = por %p2114_p13, %p2113_p12 }
 0x190   : > { %p2116_p1 = pnand %p2115_p0, %p2109_p9 }
 0x192   : > { %2119 = shalt.err (!%p2116_p1)
}
 0x193   : > { %s2173_s7 = smov 128   ;;  %s2174_s14 = smov 8   ;;  %1396 = vst [vmem:[%s2627_s9 + $0xf8] sm:$0xff] %v1364_v15 }
 0x194   : > { %1939 = dma.vmem_to_hbm [thread:$0]  (%p2240_p4), %s2734_s13, 4096, %s2732_s22, %s2743_s18, %s2173_s7, %s2173_s7, %s2174_s14  }
 0x195 PF: > { %p1945_p2 = scmp.ge.s32.totalorder %s2170_s20, 2  ;;  %s1435_s21 = sand.u32 1, %s2150_s15  }
 0x196   : > { %s1436_s24 = scalar_lea.sflag [#allocation4], %s1435_s21 }
 0x197   : > { %p1942_p3 = pnand %p1945_p2, %p2247_p8 }
 0x199   : > { %2145 = dma.done.wait (!%p1942_p3), %s1436_s24, 4096  }
 0x19a   : > { %2147 = vsyncadd (!%p1942_p3), %s1436_s24, 4294963200  ;;  %s18_s20 = sadd.s32 1, %s2170_s20   ;;  %s2798_s15 = smov %s2154_s16 }
 0x19b   : > { %p15_p5 = scmp.ge.s32.totalorder %s18_s20, 4   ;;  %s2799_s16 = smov %s2158_s17 }
 0x19c   : > { %s2800_s17 = smov %s2253_s28  ;;  %s2801_s18 = smov %s2166_s19 }
 0x19d   : > { %s2802_s19 = smov %s2804_s23  ;;  %17 = sbr.rel (!%p15_p5) target bundleno = 4 (0x4), region = 91 }
 0x1a4   :  { %1449 = vsyncpa [#allocation4], 1 }
 0x1a5   :  { %1451 = vsyncpa [#allocation4 + $0x1], 1 }

</bundles_post_ra>
